<compile_context>
chip_gen: v7x
topology: tpu7x:2x2x1
jax: 0.10.0
libtpu: 0.0.40
codegen_flags: <defaults>
</compile_context>

<pallas_src>
import functools
import math

import jax
import jax.numpy as jnp
from jax.experimental import pallas as pl
from jax.experimental.pallas import tpu as pltpu


def _activation(name, x, prelu_slope=0.25):
    if name == 'ReLU':
        return jnp.maximum(x, 0.0)
    elif name == 'LeakyReLU':
        return jnp.where(x >= 0, x, 0.01 * x)
    elif name == 'Sigmoid':
        return jax.nn.sigmoid(x)
    elif name == 'Tanh':
        return jnp.tanh(x)
    elif name == 'PReLU':
        # TODO(synk): nn.PReLU has a learnable slope; default init value 0.25 is used here.
        return jnp.where(x >= 0, x, prelu_slope * x)
    else:
        raise ValueError('Unknown activation function')


def _make_kernel(activation_name):
    def kernel(x_ref,
               w1_ref, b1_ref, w2_ref, b2_ref, w3_ref, b3_ref,
               w4_ref, b4_ref, w5_ref, b5_ref, o_ref):
        # Fused reparameterization in VMEM from the packed [3, ...] (mu, log_sigma, eps):
        # VPU/EUP work hidden under the MXU matmuls; sampled weights never touch HBM.
        def sample(p_ref):
            return p_ref[0] + jnp.exp(p_ref[1]) * p_ref[2]

        h = x_ref[...]
        # Layers 1..4: bf16 MXU matmul (f32 accumulate) + f32 bias + activation.
        for w_ref, b_ref in ((w1_ref, b1_ref), (w2_ref, b2_ref),
                             (w3_ref, b3_ref), (w4_ref, b4_ref)):
            w = sample(w_ref)                       # [in, out]  f32
            b = sample(b_ref)                       # [1, out]   f32
            h = jnp.dot(h.astype(jnp.bfloat16), w.astype(jnp.bfloat16),
                        preferred_element_type=jnp.float32) + b
            h = _activation(activation_name, h)

        # Layer 5 (out_features == 1): VPU multiply + lane reduce in f32, keeping the
        # N=1 shape off the MXU.  w5 is stored as a [1, l4] row (pure broadcast).
        w5 = sample(w5_ref)                         # [1, l4]
        b5 = sample(b5_ref)                         # [1, 1]
        out = jnp.sum(h * w5, axis=-1, keepdims=True) + b5
        o_ref[...] = out.astype(o_ref.dtype)

    return kernel


def _round_up(n, m):
    return -(-n // m) * m


def _draw_eps(key, params):
    """Fresh reparameterization noise for one forward call, drawn with a SINGLE flat
    jax.random.normal call (one RNG kernel instead of 10)."""
    shapes = []
    for (w_mu, _, b_mu, _) in params:
        shapes.append(w_mu.shape)
        shapes.append(b_mu.shape)
    sizes = [int(math.prod(s)) for s in shapes]
    flat = jax.random.normal(key, (sum(sizes),), jnp.float32)
    eps, off = [], 0
    for s, n in zip(shapes, sizes):
        eps.append(flat[off:off + n].reshape(s))
        off += n
    return [(eps[2 * i], eps[2 * i + 1]) for i in range(len(params))]


def bayesian_regression_net_forward(x, params, key, activation_name='ReLU',
                                    min_grid_steps=2, max_tb=2048):
    """x: [batch, input_size] f32.
    params: list of 5 tuples (w_mu, w_log_sigma, b_mu, b_log_sigma); layer-1..4 weights
    stored as [in, out], layer-5 weight stored as a [1, l4] row (out_features == 1).
    key: PRNG key used to draw fresh eps for THIS forward pass.
    min_grid_steps: 2 keeps both v7x TensorCores fed; use 1 on single-TC v5e/v6e."""
    batch, in_dim = x.shape
    eps = _draw_eps(key, params)

    # Largest batch tile (multiple of 8 sublanes) giving >= min_grid_steps grid steps,
    # capped at max_tb rows.  No jnp.pad: the partial last tile runs OOB harmlessly.
    tb = _round_up(pl.cdiv(batch, min_grid_steps), 8)
    tb = max(8, min(tb, max_tb, _round_up(batch, 8)))
    num_tiles = pl.cdiv(batch, tb)

    const3 = lambda i: (0, 0, 0)   # packed params: same block every step -> VMEM-resident
    flat_args = [x]
    in_specs = [pl.BlockSpec((tb, in_dim), lambda i: (i, 0))]
    n_param_elems = 0
    for (w_mu, w_ls, b_mu, b_ls), (w_e, b_e) in zip(params, eps):
        w_pack = jnp.stack([w_mu, w_ls, w_e])       # [3, in, out]
        b_pack = jnp.stack([b_mu, b_ls, b_e])       # [3, 1, out]
        flat_args += [w_pack, b_pack]
        in_specs += [pl.BlockSpec(w_pack.shape, const3),
                     pl.BlockSpec(b_pack.shape, const3)]
        n_param_elems += w_mu.size + b_mu.size

    # Advisory cost so XLA can overlap the eps draw / packing with the kernel.
    matmul_flops = 2 * batch * sum(p[0].size for p in params)
    reparam_flops = 2 * num_tiles * n_param_elems
    transcendentals = num_tiles * n_param_elems     # one exp per param element per step
    if activation_name in ('Sigmoid', 'Tanh'):
        transcendentals += batch * sum(p[0].shape[-1] for p in params[:4])
    bytes_accessed = 4 * (x.size + 3 * n_param_elems + batch)
    cost = pl.CostEstimate(flops=int(matmul_flops + reparam_flops),
                           transcendentals=int(transcendentals),
                           bytes_accessed=int(bytes_accessed))

    return pl.pallas_call(
        _make_kernel(activation_name),
        out_shape=jax.ShapeDtypeStruct((batch, 1), jnp.float32),
        grid=(num_tiles,),
        in_specs=in_specs,
        out_specs=pl.BlockSpec((tb, 1), lambda i: (i, 0)),
        compiler_params=pltpu.CompilerParams(
            dimension_semantics=("parallel",)),     # v7x megacore shares the batch axis
        cost_estimate=cost,
    )(*flat_args)


def init_bayesian_regression_net_params(key, input_size, l1, prior_mu, prior_sigma):
    """Mimics torchbnn.BayesLinear.reset_parameters: mu ~ U(-1/sqrt(fan_in), 1/sqrt(fan_in)),
    log_sigma filled with log(prior_sigma). prior_mu only enters the KL loss, not forward.
    Weights stored as [in, out]; the final layer's weight stored as a [1, l4] row."""
    del prior_mu  # forward-pass independent
    dims = [input_size, l1, l1 * 2, l1 * 4, l1 * 8, 1]
    params = []
    for i in range(5):
        fan_in, fan_out = dims[i], dims[i + 1]
        key, k_wmu, k_bmu = jax.random.split(key, 3)
        stdv = 1.0 / math.sqrt(fan_in)
        w_shape = (fan_in, fan_out) if i < 4 else (1, fan_in)
        w_mu = jax.random.uniform(k_wmu, w_shape, jnp.float32, -stdv, stdv)
        b_mu = jax.random.uniform(k_bmu, (1, fan_out), jnp.float32, -stdv, stdv)
        w_log_sigma = jnp.full(w_shape, math.log(prior_sigma), jnp.float32)
        b_log_sigma = jnp.full((1, fan_out), math.log(prior_sigma), jnp.float32)
        params.append((w_mu, w_log_sigma, b_mu, b_log_sigma))
    return params


def _reference_forward(x, params, key, activation_name):
    """Pure-JAX reference using the same per-call eps and the same bf16 matmul operands."""
    eps = _draw_eps(key, params)
    h = x
    for i, ((w_mu, w_ls, b_mu, b_ls), (w_e, b_e)) in enumerate(zip(params, eps)):
        w = w_mu + jnp.exp(w_ls) * w_e
        b = b_mu + jnp.exp(b_ls) * b_e
        if i < 4:
            h = jnp.dot(h.astype(jnp.bfloat16), w.astype(jnp.bfloat16),
                        preferred_element_type=jnp.float32) + b
            h = _activation(activation_name, h)
        else:  # final layer stored as [1, l4] row
            h = jnp.sum(h * w, axis=-1, keepdims=True) + b
    return h


if __name__ == "__main__":
    key = jax.random.PRNGKey(0)
    k_x, k_init, k_fwd = jax.random.split(key, 3)

    # Shapes consistent with the module: input_size=16, l1=32 => hidden 32/64/128/256 -> 1.
    # batch=256 exercises the batch grid (2 tiles of 128 rows -> both v7x TCs) while small.
    batch = 256
    input_size = 16
    l1 = 32
    prior_mu = 0.0
    prior_sigma = 0.1
    activation_name = 'ReLU'

    x = jax.random.normal(k_x, (batch, input_size), jnp.float32)
    params = init_bayesian_regression_net_params(k_init, input_size, l1, prior_mu, prior_sigma)

    fwd = jax.jit(functools.partial(bayesian_regression_net_forward,
                                    activation_name=activation_name))
    out = jax.block_until_ready(fwd(x, params, k_fwd))

    ref = _reference_forward(x, params, k_fwd, activation_name)
    assert out.shape == (batch, 1)
    max_err = float(jnp.max(jnp.abs(out - ref)))
    assert jnp.allclose(out, ref, atol=2e-2, rtol=2e-2), f"max abs err {max_err}"

    print("KERNEL_OK")
</pallas_src>

<mosaic_0001>
module attributes {stable_mosaic.version = 11 : i64} {
  func.func @kernel(%arg0: i32, %arg1: memref<128x16xf32, #tpu.memory_space<vmem>>, %arg2: memref<3x16x32xf32, #tpu.memory_space<vmem>>, %arg3: memref<3x1x32xf32, #tpu.memory_space<vmem>>, %arg4: memref<3x32x64xf32, #tpu.memory_space<vmem>>, %arg5: memref<3x1x64xf32, #tpu.memory_space<vmem>>, %arg6: memref<3x64x128xf32, #tpu.memory_space<vmem>>, %arg7: memref<3x1x128xf32, #tpu.memory_space<vmem>>, %arg8: memref<3x128x256xf32, #tpu.memory_space<vmem>>, %arg9: memref<3x1x256xf32, #tpu.memory_space<vmem>>, %arg10: memref<3x1x256xf32, #tpu.memory_space<vmem>>, %arg11: memref<3x1x1xf32, #tpu.memory_space<vmem>>, %arg12: memref<128x1xf32, #tpu.memory_space<vmem>>) attributes {dimension_semantics = [#tpu.dimension_semantics<parallel>], iteration_bounds = array<i64: 2>, scalar_prefetch = 0 : i64, scratch_operands = 0 : i64, tpu.core_type = #tpu.core_type<tc>, window_params = [{transform_indices = @transform_0, window_bounds = array<i64: 128, 16>}, {pipeline_mode = #tpu.pipeline_mode<synchronous>, transform_indices = @transform_1, window_bounds = array<i64: 3, 16, 32>}, {pipeline_mode = #tpu.pipeline_mode<synchronous>, transform_indices = @transform_2, window_bounds = array<i64: 3, 1, 32>}, {pipeline_mode = #tpu.pipeline_mode<synchronous>, transform_indices = @transform_3, window_bounds = array<i64: 3, 32, 64>}, {pipeline_mode = #tpu.pipeline_mode<synchronous>, transform_indices = @transform_4, window_bounds = array<i64: 3, 1, 64>}, {pipeline_mode = #tpu.pipeline_mode<synchronous>, transform_indices = @transform_5, window_bounds = array<i64: 3, 64, 128>}, {pipeline_mode = #tpu.pipeline_mode<synchronous>, transform_indices = @transform_6, window_bounds = array<i64: 3, 1, 128>}, {pipeline_mode = #tpu.pipeline_mode<synchronous>, transform_indices = @transform_7, window_bounds = array<i64: 3, 128, 256>}, {pipeline_mode = #tpu.pipeline_mode<synchronous>, transform_indices = @transform_8, window_bounds = array<i64: 3, 1, 256>}, {pipeline_mode = #tpu.pipeline_mode<synchronous>, transform_indices = @transform_9, window_bounds = array<i64: 3, 1, 256>}, {pipeline_mode = #tpu.pipeline_mode<synchronous>, transform_indices = @transform_10, window_bounds = array<i64: 3, 1, 1>}, {transform_indices = @transform_11, window_bounds = array<i64: 128, 1>}]} {
    %c0 = arith.constant 0 : index
    %c0_0 = arith.constant 0 : index
    %0 = vector.load %arg1[%c0, %c0_0] : memref<128x16xf32, #tpu.memory_space<vmem>>, vector<128x16xf32>
    %c0_1 = arith.constant 0 : index
    %c0_2 = arith.constant 0 : index
    %c0_3 = arith.constant 0 : index
    %1 = vector.load %arg2[%c0_1, %c0_2, %c0_3] : memref<3x16x32xf32, #tpu.memory_space<vmem>>, vector<1x16x32xf32>
    %2 = vector.shape_cast %1 : vector<1x16x32xf32> to vector<16x32xf32>
    %c1 = arith.constant 1 : index
    %c0_4 = arith.constant 0 : index
    %c0_5 = arith.constant 0 : index
    %3 = vector.load %arg2[%c1, %c0_4, %c0_5] : memref<3x16x32xf32, #tpu.memory_space<vmem>>, vector<1x16x32xf32>
    %4 = vector.shape_cast %3 : vector<1x16x32xf32> to vector<16x32xf32>
    %5 = math.exp %4 : vector<16x32xf32>
    %c2 = arith.constant 2 : index
    %c0_6 = arith.constant 0 : index
    %c0_7 = arith.constant 0 : index
    %6 = vector.load %arg2[%c2, %c0_6, %c0_7] : memref<3x16x32xf32, #tpu.memory_space<vmem>>, vector<1x16x32xf32>
    %7 = vector.shape_cast %6 : vector<1x16x32xf32> to vector<16x32xf32>
    %8 = arith.mulf %5, %7 : vector<16x32xf32>
    %9 = arith.addf %2, %8 : vector<16x32xf32>
    %c0_8 = arith.constant 0 : index
    %c0_9 = arith.constant 0 : index
    %c0_10 = arith.constant 0 : index
    %10 = vector.load %arg3[%c0_8, %c0_9, %c0_10] : memref<3x1x32xf32, #tpu.memory_space<vmem>>, vector<1x1x32xf32>
    %11 = vector.shape_cast %10 : vector<1x1x32xf32> to vector<1x32xf32>
    %c1_11 = arith.constant 1 : index
    %c0_12 = arith.constant 0 : index
    %c0_13 = arith.constant 0 : index
    %12 = vector.load %arg3[%c1_11, %c0_12, %c0_13] : memref<3x1x32xf32, #tpu.memory_space<vmem>>, vector<1x1x32xf32>
    %13 = vector.shape_cast %12 : vector<1x1x32xf32> to vector<1x32xf32>
    %14 = math.exp %13 : vector<1x32xf32>
    %c2_14 = arith.constant 2 : index
    %c0_15 = arith.constant 0 : index
    %c0_16 = arith.constant 0 : index
    %15 = vector.load %arg3[%c2_14, %c0_15, %c0_16] : memref<3x1x32xf32, #tpu.memory_space<vmem>>, vector<1x1x32xf32>
    %16 = vector.shape_cast %15 : vector<1x1x32xf32> to vector<1x32xf32>
    %17 = arith.mulf %14, %16 : vector<1x32xf32>
    %18 = arith.addf %11, %17 : vector<1x32xf32>
    %19 = arith.truncf %0 : vector<128x16xf32> to vector<128x16xbf16>
    %20 = arith.truncf %9 : vector<16x32xf32> to vector<16x32xbf16>
    %cst = arith.constant dense<0.000000e+00> : vector<128x32xf32>
    %21 = tpu.matmul %19, %20, %cst {dimension_numbers = #tpu.dot_dimension_numbers<[1], [0], [0], [1], [0, 0, 1, 1], [], []>} : vector<128x16xbf16>, vector<16x32xbf16>, vector<128x32xf32> -> vector<128x32xf32>
    %22 = vector.broadcast %18 : vector<1x32xf32> to vector<128x32xf32>
    %23 = arith.addf %21, %22 : vector<128x32xf32>
    %cst_17 = arith.constant 0.000000e+00 : f32
    %24 = vector.broadcast %cst_17 : f32 to vector<128x32xf32>
    %25 = arith.maximumf %23, %24 : vector<128x32xf32>
    %c0_18 = arith.constant 0 : index
    %c0_19 = arith.constant 0 : index
    %c0_20 = arith.constant 0 : index
    %26 = vector.load %arg4[%c0_18, %c0_19, %c0_20] : memref<3x32x64xf32, #tpu.memory_space<vmem>>, vector<1x32x64xf32>
    %27 = vector.shape_cast %26 : vector<1x32x64xf32> to vector<32x64xf32>
    %c1_21 = arith.constant 1 : index
    %c0_22 = arith.constant 0 : index
    %c0_23 = arith.constant 0 : index
    %28 = vector.load %arg4[%c1_21, %c0_22, %c0_23] : memref<3x32x64xf32, #tpu.memory_space<vmem>>, vector<1x32x64xf32>
    %29 = vector.shape_cast %28 : vector<1x32x64xf32> to vector<32x64xf32>
    %30 = math.exp %29 : vector<32x64xf32>
    %c2_24 = arith.constant 2 : index
    %c0_25 = arith.constant 0 : index
    %c0_26 = arith.constant 0 : index
    %31 = vector.load %arg4[%c2_24, %c0_25, %c0_26] : memref<3x32x64xf32, #tpu.memory_space<vmem>>, vector<1x32x64xf32>
    %32 = vector.shape_cast %31 : vector<1x32x64xf32> to vector<32x64xf32>
    %33 = arith.mulf %30, %32 : vector<32x64xf32>
    %34 = arith.addf %27, %33 : vector<32x64xf32>
    %c0_27 = arith.constant 0 : index
    %c0_28 = arith.constant 0 : index
    %c0_29 = arith.constant 0 : index
    %35 = vector.load %arg5[%c0_27, %c0_28, %c0_29] : memref<3x1x64xf32, #tpu.memory_space<vmem>>, vector<1x1x64xf32>
    %36 = vector.shape_cast %35 : vector<1x1x64xf32> to vector<1x64xf32>
    %c1_30 = arith.constant 1 : index
    %c0_31 = arith.constant 0 : index
    %c0_32 = arith.constant 0 : index
    %37 = vector.load %arg5[%c1_30, %c0_31, %c0_32] : memref<3x1x64xf32, #tpu.memory_space<vmem>>, vector<1x1x64xf32>
    %38 = vector.shape_cast %37 : vector<1x1x64xf32> to vector<1x64xf32>
    %39 = math.exp %38 : vector<1x64xf32>
    %c2_33 = arith.constant 2 : index
    %c0_34 = arith.constant 0 : index
    %c0_35 = arith.constant 0 : index
    %40 = vector.load %arg5[%c2_33, %c0_34, %c0_35] : memref<3x1x64xf32, #tpu.memory_space<vmem>>, vector<1x1x64xf32>
    %41 = vector.shape_cast %40 : vector<1x1x64xf32> to vector<1x64xf32>
    %42 = arith.mulf %39, %41 : vector<1x64xf32>
    %43 = arith.addf %36, %42 : vector<1x64xf32>
    %44 = arith.truncf %25 : vector<128x32xf32> to vector<128x32xbf16>
    %45 = arith.truncf %34 : vector<32x64xf32> to vector<32x64xbf16>
    %cst_36 = arith.constant dense<0.000000e+00> : vector<128x64xf32>
    %46 = tpu.matmul %44, %45, %cst_36 {dimension_numbers = #tpu.dot_dimension_numbers<[1], [0], [0], [1], [0, 0, 1, 1], [], []>} : vector<128x32xbf16>, vector<32x64xbf16>, vector<128x64xf32> -> vector<128x64xf32>
    %47 = vector.broadcast %43 : vector<1x64xf32> to vector<128x64xf32>
    %48 = arith.addf %46, %47 : vector<128x64xf32>
    %cst_37 = arith.constant 0.000000e+00 : f32
    %49 = vector.broadcast %cst_37 : f32 to vector<128x64xf32>
    %50 = arith.maximumf %48, %49 : vector<128x64xf32>
    %c0_38 = arith.constant 0 : index
    %c0_39 = arith.constant 0 : index
    %c0_40 = arith.constant 0 : index
    %51 = vector.load %arg6[%c0_38, %c0_39, %c0_40] : memref<3x64x128xf32, #tpu.memory_space<vmem>>, vector<1x64x128xf32>
    %52 = vector.shape_cast %51 : vector<1x64x128xf32> to vector<64x128xf32>
    %c1_41 = arith.constant 1 : index
    %c0_42 = arith.constant 0 : index
    %c0_43 = arith.constant 0 : index
    %53 = vector.load %arg6[%c1_41, %c0_42, %c0_43] : memref<3x64x128xf32, #tpu.memory_space<vmem>>, vector<1x64x128xf32>
    %54 = vector.shape_cast %53 : vector<1x64x128xf32> to vector<64x128xf32>
    %55 = math.exp %54 : vector<64x128xf32>
    %c2_44 = arith.constant 2 : index
    %c0_45 = arith.constant 0 : index
    %c0_46 = arith.constant 0 : index
    %56 = vector.load %arg6[%c2_44, %c0_45, %c0_46] : memref<3x64x128xf32, #tpu.memory_space<vmem>>, vector<1x64x128xf32>
    %57 = vector.shape_cast %56 : vector<1x64x128xf32> to vector<64x128xf32>
    %58 = arith.mulf %55, %57 : vector<64x128xf32>
    %59 = arith.addf %52, %58 : vector<64x128xf32>
    %c0_47 = arith.constant 0 : index
    %c0_48 = arith.constant 0 : index
    %c0_49 = arith.constant 0 : index
    %60 = vector.load %arg7[%c0_47, %c0_48, %c0_49] : memref<3x1x128xf32, #tpu.memory_space<vmem>>, vector<1x1x128xf32>
    %61 = vector.shape_cast %60 : vector<1x1x128xf32> to vector<1x128xf32>
    %c1_50 = arith.constant 1 : index
    %c0_51 = arith.constant 0 : index
    %c0_52 = arith.constant 0 : index
    %62 = vector.load %arg7[%c1_50, %c0_51, %c0_52] : memref<3x1x128xf32, #tpu.memory_space<vmem>>, vector<1x1x128xf32>
    %63 = vector.shape_cast %62 : vector<1x1x128xf32> to vector<1x128xf32>
    %64 = math.exp %63 : vector<1x128xf32>
    %c2_53 = arith.constant 2 : index
    %c0_54 = arith.constant 0 : index
    %c0_55 = arith.constant 0 : index
    %65 = vector.load %arg7[%c2_53, %c0_54, %c0_55] : memref<3x1x128xf32, #tpu.memory_space<vmem>>, vector<1x1x128xf32>
    %66 = vector.shape_cast %65 : vector<1x1x128xf32> to vector<1x128xf32>
    %67 = arith.mulf %64, %66 : vector<1x128xf32>
    %68 = arith.addf %61, %67 : vector<1x128xf32>
    %69 = arith.truncf %50 : vector<128x64xf32> to vector<128x64xbf16>
    %70 = arith.truncf %59 : vector<64x128xf32> to vector<64x128xbf16>
    %cst_56 = arith.constant dense<0.000000e+00> : vector<128x128xf32>
    %71 = tpu.matmul %69, %70, %cst_56 {dimension_numbers = #tpu.dot_dimension_numbers<[1], [0], [0], [1], [0, 0, 1, 1], [], []>} : vector<128x64xbf16>, vector<64x128xbf16>, vector<128x128xf32> -> vector<128x128xf32>
    %72 = vector.broadcast %68 : vector<1x128xf32> to vector<128x128xf32>
    %73 = arith.addf %71, %72 : vector<128x128xf32>
    %cst_57 = arith.constant 0.000000e+00 : f32
    %74 = vector.broadcast %cst_57 : f32 to vector<128x128xf32>
    %75 = arith.maximumf %73, %74 : vector<128x128xf32>
    %c0_58 = arith.constant 0 : index
    %c0_59 = arith.constant 0 : index
    %c0_60 = arith.constant 0 : index
    %76 = vector.load %arg8[%c0_58, %c0_59, %c0_60] : memref<3x128x256xf32, #tpu.memory_space<vmem>>, vector<1x128x256xf32>
    %77 = vector.shape_cast %76 : vector<1x128x256xf32> to vector<128x256xf32>
    %c1_61 = arith.constant 1 : index
    %c0_62 = arith.constant 0 : index
    %c0_63 = arith.constant 0 : index
    %78 = vector.load %arg8[%c1_61, %c0_62, %c0_63] : memref<3x128x256xf32, #tpu.memory_space<vmem>>, vector<1x128x256xf32>
    %79 = vector.shape_cast %78 : vector<1x128x256xf32> to vector<128x256xf32>
    %80 = math.exp %79 : vector<128x256xf32>
    %c2_64 = arith.constant 2 : index
    %c0_65 = arith.constant 0 : index
    %c0_66 = arith.constant 0 : index
    %81 = vector.load %arg8[%c2_64, %c0_65, %c0_66] : memref<3x128x256xf32, #tpu.memory_space<vmem>>, vector<1x128x256xf32>
    %82 = vector.shape_cast %81 : vector<1x128x256xf32> to vector<128x256xf32>
    %83 = arith.mulf %80, %82 : vector<128x256xf32>
    %84 = arith.addf %77, %83 : vector<128x256xf32>
    %c0_67 = arith.constant 0 : index
    %c0_68 = arith.constant 0 : index
    %c0_69 = arith.constant 0 : index
    %85 = vector.load %arg9[%c0_67, %c0_68, %c0_69] : memref<3x1x256xf32, #tpu.memory_space<vmem>>, vector<1x1x256xf32>
    %86 = vector.shape_cast %85 : vector<1x1x256xf32> to vector<1x256xf32>
    %c1_70 = arith.constant 1 : index
    %c0_71 = arith.constant 0 : index
    %c0_72 = arith.constant 0 : index
    %87 = vector.load %arg9[%c1_70, %c0_71, %c0_72] : memref<3x1x256xf32, #tpu.memory_space<vmem>>, vector<1x1x256xf32>
    %88 = vector.shape_cast %87 : vector<1x1x256xf32> to vector<1x256xf32>
    %89 = math.exp %88 : vector<1x256xf32>
    %c2_73 = arith.constant 2 : index
    %c0_74 = arith.constant 0 : index
    %c0_75 = arith.constant 0 : index
    %90 = vector.load %arg9[%c2_73, %c0_74, %c0_75] : memref<3x1x256xf32, #tpu.memory_space<vmem>>, vector<1x1x256xf32>
    %91 = vector.shape_cast %90 : vector<1x1x256xf32> to vector<1x256xf32>
    %92 = arith.mulf %89, %91 : vector<1x256xf32>
    %93 = arith.addf %86, %92 : vector<1x256xf32>
    %94 = arith.truncf %75 : vector<128x128xf32> to vector<128x128xbf16>
    %95 = arith.truncf %84 : vector<128x256xf32> to vector<128x256xbf16>
    %cst_76 = arith.constant dense<0.000000e+00> : vector<128x256xf32>
    %96 = tpu.matmul %94, %95, %cst_76 {dimension_numbers = #tpu.dot_dimension_numbers<[1], [0], [0], [1], [0, 0, 1, 1], [], []>} : vector<128x128xbf16>, vector<128x256xbf16>, vector<128x256xf32> -> vector<128x256xf32>
    %97 = vector.broadcast %93 : vector<1x256xf32> to vector<128x256xf32>
    %98 = arith.addf %96, %97 : vector<128x256xf32>
    %cst_77 = arith.constant 0.000000e+00 : f32
    %99 = vector.broadcast %cst_77 : f32 to vector<128x256xf32>
    %100 = arith.maximumf %98, %99 : vector<128x256xf32>
    %c0_78 = arith.constant 0 : index
    %c0_79 = arith.constant 0 : index
    %c0_80 = arith.constant 0 : index
    %101 = vector.load %arg10[%c0_78, %c0_79, %c0_80] : memref<3x1x256xf32, #tpu.memory_space<vmem>>, vector<1x1x256xf32>
    %102 = vector.shape_cast %101 : vector<1x1x256xf32> to vector<1x256xf32>
    %c1_81 = arith.constant 1 : index
    %c0_82 = arith.constant 0 : index
    %c0_83 = arith.constant 0 : index
    %103 = vector.load %arg10[%c1_81, %c0_82, %c0_83] : memref<3x1x256xf32, #tpu.memory_space<vmem>>, vector<1x1x256xf32>
    %104 = vector.shape_cast %103 : vector<1x1x256xf32> to vector<1x256xf32>
    %105 = math.exp %104 : vector<1x256xf32>
    %c2_84 = arith.constant 2 : index
    %c0_85 = arith.constant 0 : index
    %c0_86 = arith.constant 0 : index
    %106 = vector.load %arg10[%c2_84, %c0_85, %c0_86] : memref<3x1x256xf32, #tpu.memory_space<vmem>>, vector<1x1x256xf32>
    %107 = vector.shape_cast %106 : vector<1x1x256xf32> to vector<1x256xf32>
    %108 = arith.mulf %105, %107 : vector<1x256xf32>
    %109 = arith.addf %102, %108 : vector<1x256xf32>
    %c0_87 = arith.constant 0 : index
    %c0_88 = arith.constant 0 : index
    %c0_89 = arith.constant 0 : index
    %110 = vector.load %arg11[%c0_87, %c0_88, %c0_89] : memref<3x1x1xf32, #tpu.memory_space<vmem>>, vector<1x1x1xf32>
    %111 = vector.shape_cast %110 : vector<1x1x1xf32> to vector<1x1xf32>
    %c1_90 = arith.constant 1 : index
    %c0_91 = arith.constant 0 : index
    %c0_92 = arith.constant 0 : index
    %112 = vector.load %arg11[%c1_90, %c0_91, %c0_92] : memref<3x1x1xf32, #tpu.memory_space<vmem>>, vector<1x1x1xf32>
    %113 = vector.shape_cast %112 : vector<1x1x1xf32> to vector<1x1xf32>
    %114 = math.exp %113 : vector<1x1xf32>
    %c2_93 = arith.constant 2 : index
    %c0_94 = arith.constant 0 : index
    %c0_95 = arith.constant 0 : index
    %115 = vector.load %arg11[%c2_93, %c0_94, %c0_95] : memref<3x1x1xf32, #tpu.memory_space<vmem>>, vector<1x1x1xf32>
    %116 = vector.shape_cast %115 : vector<1x1x1xf32> to vector<1x1xf32>
    %117 = arith.mulf %114, %116 : vector<1x1xf32>
    %118 = arith.addf %111, %117 : vector<1x1xf32>
    %119 = vector.broadcast %109 : vector<1x256xf32> to vector<128x256xf32>
    %120 = arith.mulf %100, %119 : vector<128x256xf32>
    %cst_96 = arith.constant dense<0.000000e+00> : vector<128xf32>
    %121 = vector.multi_reduction <add>, %120, %cst_96 [1] : vector<128x256xf32> to vector<128xf32>
    %122 = vector.shape_cast %121 : vector<128xf32> to vector<128x1xf32>
    %123 = vector.broadcast %118 : vector<1x1xf32> to vector<128x1xf32>
    %124 = arith.addf %122, %123 : vector<128x1xf32>
    %c0_97 = arith.constant 0 : index
    %c0_98 = arith.constant 0 : index
    %125 = vector.load %arg12[%c0_97, %c0_98] : memref<128x1xf32, #tpu.memory_space<vmem>>, vector<128x1xf32>
    tpu.vector_store %arg12[%c0_97, %c0_98], %124 {strides = array<i32>} : memref<128x1xf32, #tpu.memory_space<vmem>>, vector<128x1xf32>,
    return
  }
  func.func @transform_0(%arg0: i32) -> (i32, i32) {
    %c0_i32 = arith.constant 0 : i32
    %c0_i32_0 = arith.constant 0 : i32
    return %arg0, %c0_i32 : i32, i32
  }
  func.func @transform_1(%arg0: i32) -> (i32, i32, i32) {
    %c0_i32 = arith.constant 0 : i32
    %c0_i32_0 = arith.constant 0 : i32
    %c0_i32_1 = arith.constant 0 : i32
    %c0_i32_2 = arith.constant 0 : i32
    return %c0_i32, %c0_i32_0, %c0_i32_1 : i32, i32, i32
  }
  func.func @transform_2(%arg0: i32) -> (i32, i32, i32) {
    %c0_i32 = arith.constant 0 : i32
    %c0_i32_0 = arith.constant 0 : i32
    %c0_i32_1 = arith.constant 0 : i32
    %c0_i32_2 = arith.constant 0 : i32
    return %c0_i32, %c0_i32_0, %c0_i32_1 : i32, i32, i32
  }
  func.func @transform_3(%arg0: i32) -> (i32, i32, i32) {
    %c0_i32 = arith.constant 0 : i32
    %c0_i32_0 = arith.constant 0 : i32
    %c0_i32_1 = arith.constant 0 : i32
    %c0_i32_2 = arith.constant 0 : i32
    return %c0_i32, %c0_i32_0, %c0_i32_1 : i32, i32, i32
  }
  func.func @transform_4(%arg0: i32) -> (i32, i32, i32) {
    %c0_i32 = arith.constant 0 : i32
    %c0_i32_0 = arith.constant 0 : i32
    %c0_i32_1 = arith.constant 0 : i32
    %c0_i32_2 = arith.constant 0 : i32
    return %c0_i32, %c0_i32_0, %c0_i32_1 : i32, i32, i32
  }
  func.func @transform_5(%arg0: i32) -> (i32, i32, i32) {
    %c0_i32 = arith.constant 0 : i32
    %c0_i32_0 = arith.constant 0 : i32
    %c0_i32_1 = arith.constant 0 : i32
    %c0_i32_2 = arith.constant 0 : i32
    return %c0_i32, %c0_i32_0, %c0_i32_1 : i32, i32, i32
  }
  func.func @transform_6(%arg0: i32) -> (i32, i32, i32) {
    %c0_i32 = arith.constant 0 : i32
    %c0_i32_0 = arith.constant 0 : i32
    %c0_i32_1 = arith.constant 0 : i32
    %c0_i32_2 = arith.constant 0 : i32
    return %c0_i32, %c0_i32_0, %c0_i32_1 : i32, i32, i32
  }
  func.func @transform_7(%arg0: i32) -> (i32, i32, i32) {
    %c0_i32 = arith.constant 0 : i32
    %c0_i32_0 = arith.constant 0 : i32
    %c0_i32_1 = arith.constant 0 : i32
    %c0_i32_2 = arith.constant 0 : i32
    return %c0_i32, %c0_i32_0, %c0_i32_1 : i32, i32, i32
  }
  func.func @transform_8(%arg0: i32) -> (i32, i32, i32) {
    %c0_i32 = arith.constant 0 : i32
    %c0_i32_0 = arith.constant 0 : i32
    %c0_i32_1 = arith.constant 0 : i32
    %c0_i32_2 = arith.constant 0 : i32
    return %c0_i32, %c0_i32_0, %c0_i32_1 : i32, i32, i32
  }
  func.func @transform_9(%arg0: i32) -> (i32, i32, i32) {
    %c0_i32 = arith.constant 0 : i32
    %c0_i32_0 = arith.constant 0 : i32
    %c0_i32_1 = arith.constant 0 : i32
    %c0_i32_2 = arith.constant 0 : i32
    return %c0_i32, %c0_i32_0, %c0_i32_1 : i32, i32, i32
  }
  func.func @transform_10(%arg0: i32) -> (i32, i32, i32) {
    %c0_i32 = arith.constant 0 : i32
    %c0_i32_0 = arith.constant 0 : i32
    %c0_i32_1 = arith.constant 0 : i32
    %c0_i32_2 = arith.constant 0 : i32
    return %c0_i32, %c0_i32_0, %c0_i32_1 : i32, i32, i32
  }
  func.func @transform_11(%arg0: i32) -> (i32, i32) {
    %c0_i32 = arith.constant 0 : i32
    %c0_i32_0 = arith.constant 0 : i32
    return %arg0, %c0_i32 : i32, i32
  }
}

</mosaic_0001>

<bundles_post_ra>
// kernel: bayesian_regression_net_forward.1
= control target key start
LH: loop header
LB: loop body
LE: loop exit
PB: predicated region body
PF: predicated region fallthrough
CT: control target
= control target key end

     0   :  { %s2050_s17 = smov 0   ;;  %s2772_s0 = inlined_call_operand.vmem [shape: f32[256,16], index: 0, kind: input, shape index: {}]   ;;  %s2773_s1 = inlined_call_operand.vmem [shape: f32[3,16,32], index: 1, kind: input, shape index: {}]   ;;  %s2774_s2 = inlined_call_operand.vmem [shape: f32[3,1,32], index: 2, kind: input, shape index: {}]   ;;  %s2775_s3 = inlined_call_operand.vmem [shape: f32[3,32,64], index: 3, kind: input, shape index: {}]   ;;  %s2776_s4 = inlined_call_operand.vmem [shape: f32[3,1,64], index: 4, kind: input, shape index: {}]   ;;  %s2777_s5 = inlined_call_operand.vmem [shape: f32[3,64,128], index: 5, kind: input, shape index: {}]   ;;  %s2778_s6 = inlined_call_operand.vmem [shape: f32[3,1,128], index: 6, kind: input, shape index: {}]   ;;  %s2779_s7 = inlined_call_operand.vmem [shape: f32[3,128,256], index: 7, kind: input, shape index: {}]   ;;  %s2780_s8 = inlined_call_operand.vmem [shape: f32[3,1,256], index: 8, kind: input, shape index: {}]   ;;  %s2781_s9 = inlined_call_operand.vmem [shape: f32[3,1,256], index: 9, kind: input, shape index: {}]   ;;  %s2782_s10 = inlined_call_operand.vmem [shape: f32[3,1,1], index: 10, kind: input, shape index: {}]   ;;  %s2783_s11 = inlined_call_operand.vmem [shape: f32[256,1], index: 11, kind: output, shape index: {}]  }
   0x1 LB: > { %s1620_s18 = sadd.s32 4294967295, %s1987_s17   ;;  %p1624_p0 = scmp.ge.s32.totalorder %s1987_s17, 1  ;;  %s1987_s17 = sphi %s2050_s17, %s21_s17  }
   0x2   : > { %p338_p1 = scmp.lt.s32.totalorder %s1987_s17, 3 }
   0x4   : > { %p339_p2 = pnand %p1624_p0, %p338_p1 }
   0x5   : > { %v1629_v0 = vld [vmem:[%s2773_s1 + $0x10] sm:$0xff] (!%p339_p2)  ;;  %s1625_s21 = sshll.u32 (!%p339_p2), %s1620_s18, 4  ;;  %v1630_v1 = vld [vmem:[%s2773_s1 + $0x18] sm:$0xff] (!%p339_p2)  ;;  %vm447_vm0 = vcmask (!%p339_p2), 130048   ;;  %v1631_v7 = vld [vmem:[%s2773_s1 + $0x20] sm:$0xff] (!%p339_p2)  ;;  %vm640_vm1 = vcmask (!%p339_p2), 261120  }
   0x6   : > { %342 = sbr.rel (%p339_p2) target bundleno = 1111 (0x457), region = 64  ;;  %v412_v2 = vmul.f32 (!%p339_p2), 1.442695, %v1629_v0  ;;  %p379_p3 = scmp.lt.s32.totalorder (!%p339_p2), %s1625_s21, 31  ;;  %v414_v3 = vmul.f32 (!%p339_p2), 1.442695, %v1630_v1 }
   0x7   : > { %v1632_v8 = vld [vmem:[%s2773_s1 + $0x28] sm:$0xff] (!%p339_p2)  ;;  %v407_v10 = vld [vmem:[%s2773_s1] sm:$0xff] (!%p339_p2)  ;;  %v1645_v43 = vld [vmem:[%s2775_s3 + $0x30] sm:$0xff] (!%p339_p2)  ;;  %vm863_vm2 = vcmask (!%p339_p2), 523264   ;;  %vm1547_vm3 = vcmask (!%p339_p2), 7168  }
   0x8   : > { %1877 = vpow2.f32 (!%p339_p2), %v412_v2  ;;  %v408_v12 = vld [vmem:[%s2773_s1 + $0x8] sm:$0xff] (!%p339_p2)  ;;  %v1643_v39 = vld [vmem:[%s2775_s3 + $0x20] sm:$0xff] (!%p339_p2)  ;;  %v1646_v44 = vld [vmem:[%s2775_s3 + $0x38] sm:$0xff] (!%p339_p2)  ;;  %v598_v45 = vmul.f32 (!%p339_p2), 1.442695, %v1645_v43 }
   0x9   : > { %1879 = vpow2.f32 (!%p339_p2), %v414_v3  ;;  %v1644_v40 = vld [vmem:[%s2775_s3 + $0x28] sm:$0xff] (!%p339_p2)  ;;  %v594_v41 = vmul.f32 (!%p339_p2), 1.442695, %v1643_v39  ;;  %v600_v46 = vmul.f32 (!%p339_p2), 1.442695, %v1646_v44  ;;  %v1647_v48 = vld [vmem:[%s2775_s3 + $0x40] sm:$0xff] (!%p339_p2) }
   0xa   : > { %v596_v42 = vmul.f32 (!%p339_p2), 1.442695, %v1644_v40  ;;  %v1648_v49 = vld [vmem:[%s2775_s3 + $0x48] sm:$0xff] (!%p339_p2)  ;;  %v585_v52 = vld [vmem:[%s2775_s3] sm:$0xff] (!%p339_p2)  ;;  %v1649_v58 = vld [vmem:[%s2775_s3 + $0x50] sm:$0xff] (!%p339_p2) }
   0xb   : > { %1881 = vpow2.f32 (!%p339_p2), %v594_v41  ;;  %v586_v53 = vld [vmem:[%s2775_s3 + $0x8] sm:$0xff] (!%p339_p2)  ;;  %v1650_v59 = vld [vmem:[%s2775_s3 + $0x58] sm:$0xff] (!%p339_p2)  ;;  %v587_v63 = vld [vmem:[%s2775_s3 + $0x10] sm:$0xff] (!%p339_p2) }
   0xc   : > { %1883 = vpow2.f32 (!%p339_p2), %v596_v42  ;;  %v588_v0 = vld [vmem:[%s2775_s3 + $0x18] sm:$0xff] (!%p339_p2)  ;;  %v783_v41 = vld [vmem:[%s2777_s5 + $0x28] sm:$0xff] (!%p339_p2) }
   0xd   : > { %s2785_s21 = smov (!%p379_p3, %s1625_s21), 31  ;;  %1885 = vpow2.f32 %v598_v45 }
   0xe   : > { %s1626_s24 = sshll.u32 %s2785_s21, 3  ;;  %1887 = vpow2.f32 %v600_v46 }
   0xf   : > { %s2072_s27 = scalar_lea.vmem %s2772_s0, %s1626_s24  ;;  %s2735_s15 = scalar_lea.vmem %s2783_s11, %s1626_s24 }
  0x10   : > { %v391_v4 = vld [vmem:[%s2072_s27] sm:$0xff]  ;;  %v392_v5 = vld [vmem:[%s2072_s27 + $0x8] sm:$0xff]  ;;  %v393_v17 = vld [vmem:[%s2072_s27 + $0x10] sm:$0xff] }
  0x11   : > { %v432_v6 = vpack.c.bf16 %v392_v5, %v391_v4  ;;  %v394_v18 = vld [vmem:[%s2072_s27 + $0x18] sm:$0xff]  ;;  %v395_v20 = vld [vmem:[%s2072_s27 + $0x20] sm:$0xff]  ;;  %v396_v21 = vld [vmem:[%s2072_s27 + $0x28] sm:$0xff] }
  0x12   : > { %v1878_v9 = vpop.eup %1877  ;;  %v433_v22 = vpack.c.bf16 %v394_v18, %v393_v17  ;;  %v434_v23 = vpack.c.bf16 %v396_v21, %v395_v20  ;;  %v397_v24 = vld [vmem:[%s2072_s27 + $0x30] sm:$0xff]  ;;  %v398_v25 = vld [vmem:[%s2072_s27 + $0x38] sm:$0xff]  ;;  %v399_v26 = vld [vmem:[%s2072_s27 + $0x40] sm:$0xff] }
  0x13   : > { %1792 = vmatprep.mubr.msk.bf16.mxu0 %vm447_vm0, %v432_v6  ;;  %v1880_v11 = vpop.eup %1879  ;;  %v419_v13 = vmul.f32 %v1878_v9, %v1631_v7  ;;  %v400_v27 = vld [vmem:[%s2072_s27 + $0x48] sm:$0xff]  ;;  %v435_v28 = vpack.c.bf16 %v398_v25, %v397_v24  ;;  %v401_v30 = vld [vmem:[%s2072_s27 + $0x50] sm:$0xff]  ;;  %v402_v31 = vld [vmem:[%s2072_s27 + $0x58] sm:$0xff] }
  0x14   : > { %v420_v14 = vmul.f32 %v1880_v11, %v1632_v8  ;;  %v436_v29 = vpack.c.bf16 %v400_v27, %v399_v26  ;;  %v403_v32 = vld [vmem:[%s2072_s27 + $0x60] sm:$0xff]  ;;  %v404_v33 = vld [vmem:[%s2072_s27 + $0x68] sm:$0xff]  ;;  %v437_v34 = vpack.c.bf16 %v402_v31, %v401_v30  ;;  %v405_v36 = vld [vmem:[%s2072_s27 + $0x70] sm:$0xff] }
  0x15   : > { %v421_v15 = vadd.f32 %v419_v13, %v407_v10  ;;  %v438_v35 = vpack.c.bf16 %v404_v33, %v403_v32  ;;  %v406_v37 = vld [vmem:[%s2072_s27 + $0x78] sm:$0xff]  ;;  %v1882_v47 = vpop.eup %1881  ;;  %v1661_v5 = vld [vmem:[%s2777_s5 + $0x40] sm:$0xff]  ;;  %v1662_v6 = vld [vmem:[%s2777_s5 + $0x48] sm:$0xff] }
  0x16   : > { %v422_v16 = vadd.f32 %v420_v14, %v408_v12  ;;  %v439_v38 = vpack.c.bf16 %v406_v37, %v405_v36  ;;  %v1884_v50 = vpop.eup %1883  ;;  %v607_v51 = vmul.f32 %v1882_v47, %v1647_v48  ;;  %v795_v7 = vmul.f32 1.442695, %v1661_v5  ;;  %v1663_v9 = vld [vmem:[%s2777_s5 + $0x50] sm:$0xff]  ;;  %v1664_v10 = vld [vmem:[%s2777_s5 + $0x58] sm:$0xff]  ;;  %v1665_v13 = vld [vmem:[%s2777_s5 + $0x60] sm:$0xff] }
  0x17   : > { %v608_v54 = vmul.f32 %v1884_v50, %v1648_v49  ;;  %v1886_v56 = vpop.eup %1885  ;;  %v797_v8 = vmul.f32 1.442695, %v1662_v6  ;;  %v799_v11 = vmul.f32 1.442695, %v1663_v9  ;;  %v801_v12 = vmul.f32 1.442695, %v1664_v10 }
  0x18   : > { %v440_v19 = vpack.c.bf16 %v422_v16, %v421_v15  ;;  %v611_v55 = vadd.f32 %v607_v51, %v585_v52  ;;  %v1888_v60 = vpop.eup %1887  ;;  %v609_v61 = vmul.f32 %v1886_v56, %v1649_v58  ;;  %1889 = vpow2.f32 %v795_v7  ;;  %v1666_v14 = vld [vmem:[%s2777_s5 + $0x68] sm:$0xff]  ;;  %v1669_v17 = vld [vmem:[%s2777_s5 + $0x80] sm:$0xff]  ;;  %v1671_v21 = vld [vmem:[%s2777_s5 + $0x90] sm:$0xff] }
  0x19   : > { %v612_v57 = vadd.f32 %v608_v54, %v586_v53  ;;  %v610_v1 = vmul.f32 %v1888_v60, %v1650_v59  ;;  %1891 = vpow2.f32 %v797_v8  ;;  %v803_v15 = vmul.f32 1.442695, %v1665_v13  ;;  %v1670_v18 = vld [vmem:[%s2777_s5 + $0x88] sm:$0xff]  ;;  %v778_v20 = vld [vmem:[%s2777_s5] sm:$0xff]  ;;  %v1672_v25 = vld [vmem:[%s2777_s5 + $0x98] sm:$0xff] }
  0x1a   : > { %1790 = vmatprep.subr.bf16.mxu0 %v440_v19  ;;  %v613_v2 = vadd.f32 %v609_v61, %v587_v63  ;;  %1893 = vpow2.f32 %v799_v11  ;;  %v805_v16 = vmul.f32 1.442695, %v1666_v14  ;;  %v781_v32 = vld [vmem:[%s2777_s5 + $0x18] sm:$0xff]  ;;  %v1633_v50 = vld [vmem:[%s2774_s2 + $0x1] sm:$0x1]  ;;  %v442_v52 = vlaneseq }
  0x1b   : > { %1791 = vmatpush3.bf16.msra.mxu0 %v440_v19  ;;  %v632_v62 = vpack.c.bf16 %v612_v57, %v611_v55  ;;  %v614_v3 = vadd.f32 %v610_v1, %v588_v0  ;;  %1895 = vpow2.f32 %v801_v12  ;;  %v426_v51 = vmul.f32 1.442695, %v1633_v50  ;;  %v1634_v54 = vld [vmem:[%s2774_s2 + $0x2] sm:$0x1]  ;;  %v423_v57 = vld [vmem:[%s2774_s2] sm:$0x1] }
  0x1c   : > { %1897 = vpow2.f32 %v803_v15  ;;  %v2206_v56 = vshrl.u32 %v442_v52, 7 }
  0x1d   : > { %1808 = vmatprep.subr.bf16.mxu1 %v632_v62  ;;  %v633_v4 = vpack.c.bf16 %v614_v3, %v613_v2  ;;  %1899 = vpow2.f32 %v805_v16 }
  0x1e   : > { %1793 = vmatmul.mubr.msk.bf16.vlgmr.msra.gmra.mrb[0].mxu0 %vm447_vm0, %v433_v22  ;;  %1809 = vmatpush3.bf16.msra.mxu1 %v632_v62  ;;  %1901 = vpow2.f32 %v426_v51  ;;  %v2212_v59 = vsub.s32 0, %v2206_v56 }
  0x1f   : > { %1796 = vmatprep.mubr.msk.bf16.mxu0 %vm447_vm0, %v434_v23  ;;  %1810 = vmatprep.subr.bf16.mxu1 %v633_v4  ;;  %v779_v23 = vld [vmem:[%s2777_s5 + $0x8] sm:$0xff] }
  0x22   : > { %1811 = vmatpush3.bf16.msra.mxu1 %v633_v4  ;;  %v1890_v19 = vpop.eup %1889 }
  0x23   : > { %v1892_v22 = vpop.eup %1891  ;;  %v820_v24 = vmul.f32 %v1890_v19, %v1669_v17 }
  0x24   : > { %v1894_v26 = vpop.eup %1893  ;;  %v821_v27 = vmul.f32 %v1892_v22, %v1670_v18 }
  0x25   : > { %v1896_v30 = vpop.eup %1895  ;;  %v828_v31 = vadd.f32 %v820_v24, %v778_v20  ;;  %v822_v33 = vmul.f32 %v1894_v26, %v1671_v21 }
  0x26   : > { %1797 = vmatmul.mubr.msk.bf16.gmra.mrb[4].mxu0 %vm447_vm0, %v435_v28  ;;  %v780_v28 = vld [vmem:[%s2777_s5 + $0x10] sm:$0xff]  ;;  %v829_v36 = vadd.f32 %v821_v27, %v779_v23  ;;  %v823_v37 = vmul.f32 %v1896_v30, %v1672_v25 }
  0x27   : > { %1800 = vmatprep.mubr.msk.bf16.mxu0 %vm447_vm0, %v436_v29  ;;  %v1673_v29 = vld [vmem:[%s2777_s5 + $0xa0] sm:$0xff]  ;;  %v830_v40 = vadd.f32 %v822_v33, %v780_v28 }
  0x28   : > { %v853_v43 = vpack.c.bf16 %v829_v36, %v828_v31  ;;  %v831_v44 = vadd.f32 %v823_v37, %v781_v32 }
  0x2a   : > { %1828 = vmatprep.subr.bf16.mxu0 %v853_v43  ;;  %v854_v47 = vpack.c.bf16 %v831_v44, %v830_v40 }
  0x2b   : > { %1829 = vmatpush3.bf16.msra.mxu0 %v853_v43 }
  0x2c   : > { %1830 = vmatprep.subr.bf16.mxu0 %v854_v47 }
  0x2e   : > { %1801 = vmatmul.mubr.msk.bf16.gmra.mrb[8].mxu0 %vm447_vm0, %v437_v34  ;;  %v1674_v34 = vld [vmem:[%s2777_s5 + $0xa8] sm:$0xff] }
  0x2f   : > { %1804 = vmatprep.mubr.msk.bf16.mxu0 %vm447_vm0, %v438_v35  ;;  %v1898_v35 = vpop.eup %1897  ;;  %1831 = vmatpush3.bf16.msra.mxu0 %v854_v47 }
  0x30   : > { %v1900_v39 = vpop.eup %1899  ;;  %v824_v42 = vmul.f32 %v1898_v35, %v1673_v29 }
  0x31   : > { %v825_v45 = vmul.f32 %v1900_v39, %v1674_v34  ;;  %v1902_v53 = vpop.eup %1901 }
  0x32   : > { %v430_v55 = vmul.f32 %v1902_v53, %v1634_v54  ;;  %v1667_v53 = vld [vmem:[%s2777_s5 + $0x70] sm:$0xff]  ;;  %v1668_v54 = vld [vmem:[%s2777_s5 + $0x78] sm:$0xff] }
  0x33   : > { %v833_v48 = vadd.f32 %v825_v45, %v783_v41 }
  0x34   : > { %v431_v58 = vadd.f32 %v430_v55, %v423_v57  ;;  %v807_v55 = vmul.f32 1.442695, %v1667_v53  ;;  %v809_v57 = vmul.f32 1.442695, %v1668_v54  ;;  %v1726_v54 = vld [vmem:[%s2779_s7 + $0x238] sm:$0xff] }
  0x36   : > { %1805 = vmatmul.mubr.msk.bf16.gmra.mrb[12].mxu0 %vm447_vm0, %v439_v38  ;;  %v782_v38 = vld [vmem:[%s2777_s5 + $0x20] sm:$0xff]  ;;  %v445_v60 = vrot.slane %v431_v58, %v2212_v59  ;;  %1903 = vpow2.f32 %v807_v55 }
  0x37   : > { %v832_v46 = vadd.f32 %v824_v42, %v782_v38  ;;  %1905 = vpow2.f32 %v809_v57  ;;  %v1704_v57 = vld [vmem:[%s2779_s7 + $0x188] sm:$0xff] }
  0x39   : > { %v855_v49 = vpack.c.bf16 %v833_v48, %v832_v46 }
  0x3b   : > { %1832 = vmatprep.subr.bf16.mxu0 %v855_v49 }
  0x3c   : > { %1833 = vmatpush3.bf16.msra.mxu0 %v855_v49 }
  0x40   : > { %v1904_v58 = vpop.eup %1903 }
  0xf1   : > { %v1794_v61 = vpop.f32.mrb[0].mxu0 }
  0xf2   : > { %v515_v62 = vadd.f32 %v1794_v61, %v445_v60  ;;  %v506_v63 = vpop.f32.mrb[1].mxu0  ;;  %v1676_v61 = vld [vmem:[%s2777_s5 + $0xb8] sm:$0xff] }
  0xf3   : > { %v507_v0 = vadd.f32 %v506_v63, %v445_v60  ;;  %v1795_v1 = vpop.f32.mrb[2].mxu0 }
  0xf4   : > { %v518_v2 = vadd.f32 %v1795_v1, %v445_v60  ;;  %v509_v3 = vpop.f32.mrb[3].mxu0  ;;  %v571_v5 = vmax.f32 %v515_v62, 0.0  ;;  %v1906_v62 = vpop.eup %1905  ;;  %v785_v1 = vld [vmem:[%s2777_s5 + $0x38] sm:$0xff] }
  0xf5   : > { %v510_v4 = vadd.f32 %v509_v3, %v445_v60  ;;  %v569_v7 = vmax.f32 %v507_v0, 0.0  ;;  %v784_v0 = vld [vmem:[%s2777_s5 + $0x30] sm:$0xff] }
  0xf6   : > { %v572_v6 = vmax.f32 %v518_v2, 0.0  ;;  %v827_v2 = vmul.f32 %v1906_v62, %v1676_v61  ;;  %v1006_v62 = vld [vmem:[%s2779_s7 + $0x28] sm:$0xff] }
  0xf7   : > { %v570_v8 = vmax.f32 %v510_v4, 0.0 }
  0xf8   : > { %v625_v9 = vpack.c.bf16 %v572_v6, %v571_v5  ;;  %v835_v4 = vadd.f32 %v827_v2, %v785_v1  ;;  %v1688_v6 = vld [vmem:[%s2779_s7 + $0x108] sm:$0xff]  ;;  %v1100_v1 = vmul.f32 1.442695, %v1704_v57  ;;  %v1731_v57 = vld [vmem:[%s2779_s7 + $0x260] sm:$0xff] }
  0xf9   : > { %v1798_v10 = vpop.f32.mrb[4].mxu0  ;;  %v624_v11 = vpack.c.bf16 %v570_v8, %v569_v7  ;;  %v1690_v7 = vld [vmem:[%s2779_s7 + $0x118] sm:$0xff]  ;;  %v1068_v8 = vmul.f32 1.442695, %v1688_v6  ;;  %v1725_v6 = vld [vmem:[%s2779_s7 + $0x230] sm:$0xff] }
  0xfa   : > { %v531_v12 = vadd.f32 %v1798_v10, %v445_v60  ;;  %v522_v13 = vpop.f32.mrb[5].mxu0  ;;  %v1687_v10 = vld [vmem:[%s2779_s7 + $0x100] sm:$0xff] }
  0xfb   : > { %v523_v14 = vadd.f32 %v522_v13, %v445_v60  ;;  %v1799_v15 = vpop.f32.mrb[6].mxu0  ;;  %1812 = vmatprep.mubr.msk.bf16.mxu1 %vm640_vm1, %v624_v11  ;;  %1907 = vpow2.f32 %v1068_v8  ;;  %v1689_v11 = vld [vmem:[%s2779_s7 + $0x110] sm:$0xff]  ;;  %v1703_v8 = vld [vmem:[%s2779_s7 + $0x180] sm:$0xff] }
  0xfc   : > { %v534_v16 = vadd.f32 %v1799_v15, %v445_v60  ;;  %v525_v17 = vpop.f32.mrb[7].mxu0  ;;  %1813 = vmatmul.mubr.msk.bf16.vlgmr.msra.gmra.mrb[0].mxu1 %vm640_vm1, %v625_v9  ;;  %v575_v19 = vmax.f32 %v531_v12, 0.0  ;;  %v1072_v9 = vmul.f32 1.442695, %v1690_v7  ;;  %v1066_v12 = vmul.f32 1.442695, %v1687_v10 }
  0xfd   : > { %v526_v18 = vadd.f32 %v525_v17, %v445_v60  ;;  %v573_v21 = vmax.f32 %v523_v14, 0.0  ;;  %v1070_v13 = vmul.f32 1.442695, %v1689_v11  ;;  %v1692_v14 = vld [vmem:[%s2779_s7 + $0x128] sm:$0xff]  ;;  %v1694_v15 = vld [vmem:[%s2779_s7 + $0x138] sm:$0xff] }
  0xfe   : > { %v576_v20 = vmax.f32 %v534_v16, 0.0  ;;  %1909 = vpow2.f32 %v1072_v9  ;;  %v1076_v16 = vmul.f32 1.442695, %v1692_v14  ;;  %v1080_v17 = vmul.f32 1.442695, %v1694_v15  ;;  %v1728_v14 = vld [vmem:[%s2779_s7 + $0x248] sm:$0xff] }
  0xff   : > { %v574_v22 = vmax.f32 %v526_v18, 0.0  ;;  %1911 = vpow2.f32 %v1066_v12  ;;  %v1691_v18 = vld [vmem:[%s2779_s7 + $0x120] sm:$0xff]  ;;  %v1705_v15 = vld [vmem:[%s2779_s7 + $0x190] sm:$0xff] }
 0x100   : > { %v627_v23 = vpack.c.bf16 %v576_v20, %v575_v19  ;;  %1913 = vpow2.f32 %v1070_v13  ;;  %v1693_v19 = vld [vmem:[%s2779_s7 + $0x130] sm:$0xff]  ;;  %v1074_v20 = vmul.f32 1.442695, %v1691_v18  ;;  %v1005_v13 = vld [vmem:[%s2779_s7 + $0x20] sm:$0xff] }
 0x101   : > { %v626_v24 = vpack.c.bf16 %v574_v22, %v573_v21  ;;  %v1802_v25 = vpop.f32.mrb[8].mxu0  ;;  %1915 = vpow2.f32 %v1076_v16  ;;  %v1078_v21 = vmul.f32 1.442695, %v1693_v19  ;;  %v1696_v22 = vld [vmem:[%s2779_s7 + $0x148] sm:$0xff]  ;;  %v1007_v18 = vld [vmem:[%s2779_s7 + $0x30] sm:$0xff] }
 0x102   : > { %v547_v26 = vadd.f32 %v1802_v25, %v445_v60  ;;  %v538_v27 = vpop.f32.mrb[9].mxu0  ;;  %1917 = vpow2.f32 %v1080_v17 }
 0x103   : > { %v539_v28 = vadd.f32 %v538_v27, %v445_v60  ;;  %v1803_v29 = vpop.f32.mrb[10].mxu0  ;;  %1816 = vmatprep.mubr.msk.bf16.mxu1 %vm640_vm1, %v626_v24  ;;  %1919 = vpow2.f32 %v1074_v20  ;;  %v1084_v24 = vmul.f32 1.442695, %v1696_v22  ;;  %v1720_v27 = vld [vmem:[%s2779_s7 + $0x208] sm:$0xff]  ;;  %v1730_v20 = vld [vmem:[%s2779_s7 + $0x258] sm:$0xff] }
 0x104   : > { %v579_v30 = vmax.f32 %v547_v26, 0.0  ;;  %v550_v31 = vadd.f32 %v1803_v29, %v445_v60  ;;  %v541_v32 = vpop.f32.mrb[11].mxu0  ;;  %1817 = vmatmul.mubr.msk.bf16.gmra.mrb[4].mxu1 %vm640_vm1, %v627_v23  ;;  %v1698_v23 = vld [vmem:[%s2779_s7 + $0x158] sm:$0xff]  ;;  %1921 = vpow2.f32 %v1078_v21  ;;  %v1695_v26 = vld [vmem:[%s2779_s7 + $0x140] sm:$0xff]  ;;  %v1098_v21 = vmul.f32 1.442695, %v1703_v8 }
 0x105   : > { %v577_v33 = vmax.f32 %v539_v28, 0.0  ;;  %v542_v34 = vadd.f32 %v541_v32, %v445_v60  ;;  %v1088_v25 = vmul.f32 1.442695, %v1698_v23  ;;  %1923 = vpow2.f32 %v1084_v24  ;;  %v1697_v28 = vld [vmem:[%s2779_s7 + $0x150] sm:$0xff]  ;;  %v1700_v32 = vld [vmem:[%s2779_s7 + $0x168] sm:$0xff] }
 0x106   : > { %v580_v35 = vmax.f32 %v550_v31, 0.0  ;;  %v1082_v29 = vmul.f32 1.442695, %v1695_v26  ;;  %v1086_v31 = vmul.f32 1.442695, %v1697_v28  ;;  %v1708_v22 = vld [vmem:[%s2779_s7 + $0x1a8] sm:$0xff] }
 0x107   : > { %v578_v36 = vmax.f32 %v542_v34, 0.0  ;;  %1925 = vpow2.f32 %v1088_v25  ;;  %v1002_v34 = vld [vmem:[%s2779_s7 + $0x8] sm:$0xff]  ;;  %v1727_v28 = vld [vmem:[%s2779_s7 + $0x240] sm:$0xff] }
 0x108   : > { %v629_v37 = vpack.c.bf16 %v580_v35, %v579_v30  ;;  %v1722_v30 = vld [vmem:[%s2779_s7 + $0x218] sm:$0xff]  ;;  %v1719_v35 = vld [vmem:[%s2779_s7 + $0x200] sm:$0xff]  ;;  %1927 = vpow2.f32 %v1082_v29  ;;  %v1102_v29 = vmul.f32 1.442695, %v1705_v15 }
 0x109   : > { %v628_v38 = vpack.c.bf16 %v578_v36, %v577_v33  ;;  %v1806_v39 = vpop.f32.mrb[12].mxu0  ;;  %v1908_v33 = vpop.eup %1907  ;;  %v1702_v36 = vld [vmem:[%s2779_s7 + $0x178] sm:$0xff]  ;;  %1929 = vpow2.f32 %v1086_v31 }
 0x10a   : > { %v563_v40 = vadd.f32 %v1806_v39, %v445_v60  ;;  %v554_v41 = vpop.f32.mrb[13].mxu0  ;;  %v1004_v39 = vld [vmem:[%s2779_s7 + $0x18] sm:$0xff] }
 0x10b   : > { %1820 = vmatprep.mubr.msk.bf16.mxu1 %vm640_vm1, %v628_v38  ;;  %v555_v42 = vadd.f32 %v554_v41, %v445_v60  ;;  %v1807_v43 = vpop.f32.mrb[14].mxu0  ;;  %v1910_v38 = vpop.eup %1909  ;;  %v1721_v41 = vld [vmem:[%s2779_s7 + $0x210] sm:$0xff] }
 0x10c   : > { %1821 = vmatmul.mubr.msk.bf16.gmra.mrb[8].mxu1 %vm640_vm1, %v629_v37  ;;  %v583_v44 = vmax.f32 %v563_v40, 0.0  ;;  %v566_v45 = vadd.f32 %v1807_v43, %v445_v60  ;;  %v557_v46 = vpop.f32.mrb[15].mxu0  ;;  %v1092_v37 = vmul.f32 1.442695, %v1700_v32  ;;  %v1164_v40 = vmul.f32 %v1908_v33, %v1720_v27  ;;  %v1699_v43 = vld [vmem:[%s2779_s7 + $0x160] sm:$0xff]  ;;  %v1010_v27 = vld [vmem:[%s2779_s7 + $0x48] sm:$0xff] }
 0x10d   : > { %v581_v47 = vmax.f32 %v555_v42, 0.0  ;;  %v558_v48 = vadd.f32 %v557_v46, %v445_v60  ;;  %v1675_v60 = vld [vmem:[%s2777_s5 + $0xb0] sm:$0xff]  ;;  %v1096_v42 = vmul.f32 1.442695, %v1702_v36  ;;  %v1001_v46 = vld [vmem:[%s2779_s7] sm:$0xff]  ;;  %v1012_v33 = vld [vmem:[%s2779_s7 + $0x58] sm:$0xff] }
 0x10e   : > { %v584_v49 = vmax.f32 %v566_v45, 0.0  ;;  %v826_v63 = vmul.f32 %v1904_v58, %v1675_v60  ;;  %v1166_v45 = vmul.f32 %v1910_v38, %v1722_v30  ;;  %1931 = vpow2.f32 %v1092_v37  ;;  %v1710_v30 = vld [vmem:[%s2779_s7 + $0x1b8] sm:$0xff]  ;;  %v1707_v37 = vld [vmem:[%s2779_s7 + $0x1a0] sm:$0xff] }
 0x10f   : > { %v582_v50 = vmax.f32 %v558_v48, 0.0  ;;  %v1701_v48 = vld [vmem:[%s2779_s7 + $0x170] sm:$0xff]  ;;  %1933 = vpow2.f32 %v1096_v42  ;;  %v1108_v36 = vmul.f32 1.442695, %v1708_v22  ;;  %v1009_v42 = vld [vmem:[%s2779_s7 + $0x40] sm:$0xff] }
 0x110   : > { %v631_v51 = vpack.c.bf16 %v584_v49, %v583_v44  ;;  %v834_v3 = vadd.f32 %v826_v63, %v784_v0  ;;  %v1912_v44 = vpop.eup %1911  ;;  %v1090_v49 = vmul.f32 1.442695, %v1699_v43  ;;  %v1094_v55 = vmul.f32 1.442695, %v1701_v48  ;;  %v1723_v63 = vld [vmem:[%s2779_s7 + $0x220] sm:$0xff]  ;;  %v1706_v0 = vld [vmem:[%s2779_s7 + $0x198] sm:$0xff] }
 0x111   : > { %v630_v52 = vpack.c.bf16 %v582_v50, %v581_v47  ;;  %v1724_v47 = vld [vmem:[%s2779_s7 + $0x228] sm:$0xff]  ;;  %v1914_v50 = vpop.eup %1913  ;;  %v1163_v53 = vmul.f32 %v1912_v44, %v1719_v35  ;;  %v1198_v60 = vadd.f32 %v1166_v45, %v1004_v39  ;;  %v1104_v7 = vmul.f32 1.442695, %v1706_v0  ;;  %v1729_v35 = vld [vmem:[%s2779_s7 + $0x250] sm:$0xff]  ;;  %v1735_v22 = vld [vmem:[%s2779_s7 + $0x280] sm:$0xff] }
 0x112   : > { %v856_v5 = vpack.c.bf16 %v835_v4, %v834_v3  ;;  %v1916_v58 = vpop.eup %1915  ;;  %v1165_v61 = vmul.f32 %v1914_v50, %v1721_v41  ;;  %1935 = vpow2.f32 %v1090_v49  ;;  %v1008_v4 = vld [vmem:[%s2779_s7 + $0x38] sm:$0xff]  ;;  %v1732_v43 = vld [vmem:[%s2779_s7 + $0x268] sm:$0xff]  ;;  %v1709_v44 = vld [vmem:[%s2779_s7 + $0x1b0] sm:$0xff]  ;;  %v1112_v50 = vmul.f32 1.442695, %v1710_v30 }
 0x113   : > { %1824 = vmatprep.mubr.msk.bf16.mxu1 %vm640_vm1, %v630_v52  ;;  %v1003_v52 = vld [vmem:[%s2779_s7 + $0x10] sm:$0xff]  ;;  %v1918_v2 = vpop.eup %1917  ;;  %v1195_v3 = vadd.f32 %v1163_v53, %v1001_v46  ;;  %1937 = vpow2.f32 %v1094_v55  ;;  %v1734_v49 = vld [vmem:[%s2779_s7 + $0x278] sm:$0xff]  ;;  %v1014_v55 = vld [vmem:[%s2779_s7 + $0x68] sm:$0xff] }
 0x114   : > { %1825 = vmatmul.mubr.msk.bf16.gmra.mrb[12].mxu1 %vm640_vm1, %v631_v51  ;;  %1834 = vmatprep.subr.bf16.mxu0 %v856_v5  ;;  %v1196_v51 = vadd.f32 %v1164_v40, %v1002_v34  ;;  %v1920_v9 = vpop.eup %1919  ;;  %v1197_v11 = vadd.f32 %v1165_v61, %v1003_v52  ;;  %v1170_v12 = vmul.f32 %v1918_v2, %v1726_v54  ;;  %1939 = vpow2.f32 %v1100_v1  ;;  %v1733_v0 = vld [vmem:[%s2779_s7 + $0x270] sm:$0xff]  ;;  %v1017_v30 = vld [vmem:[%s2779_s7 + $0x80] sm:$0xff] }
 0x115   : > { %1835 = vmatpush3.bf16.msra.mxu0 %v856_v5  ;;  %v1168_v5 = vmul.f32 %v1916_v58, %v1724_v47  ;;  %v1922_v16 = vpop.eup %1921  ;;  %v1167_v19 = vmul.f32 %v1920_v9, %v1723_v63  ;;  %1941 = vpow2.f32 %v1104_v7  ;;  %v1011_v47 = vld [vmem:[%s2779_s7 + $0x50] sm:$0xff]  ;;  %v1106_v58 = vmul.f32 1.442695, %v1707_v37  ;;  %v1736_v7 = vld [vmem:[%s2779_s7 + $0x288] sm:$0xff] }
 0x116   : > { %v1245_v10 = vpack.c.bf16 %v1198_v60, %v1196_v51  ;;  %v1924_v23 = vpop.eup %1923  ;;  %v2358_v24 = vpack.c.bf16 %v1197_v11, %v1195_v3  ;;  %v1202_v25 = vadd.f32 %v1170_v12, %v1008_v4  ;;  %v1169_v26 = vmul.f32 %v1922_v16, %v1725_v6  ;;  %v1013_v6 = vld [vmem:[%s2779_s7 + $0x60] sm:$0xff]  ;;  %v1738_v12 = vld [vmem:[%s2779_s7 + $0x298] sm:$0xff] }
 0x117   : > { %v1200_v17 = vadd.f32 %v1168_v5, %v1006_v62  ;;  %v1926_v31 = vpop.eup %1925  ;;  %v1199_v32 = vadd.f32 %v1167_v19, %v1005_v13  ;;  %v1172_v34 = vmul.f32 %v1924_v23, %v1728_v14  ;;  %1943 = vpow2.f32 %v1098_v21  ;;  %v1016_v62 = vld [vmem:[%s2779_s7 + $0x78] sm:$0xff] }
 0x118   : > { %1271 = vmatprep.subr.bf16.mxu0 %v1245_v10  ;;  %1852 = vmatprep.subr.bf16.mxu1 %v1245_v10  ;;  %v1928_v38 = vpop.eup %1927  ;;  %v1201_v40 = vadd.f32 %v1169_v26, %v1007_v18  ;;  %v1174_v41 = vmul.f32 %v1926_v31, %v1730_v20  ;;  %1945 = vpow2.f32 %v1102_v29  ;;  %v1110_v1 = vmul.f32 1.442695, %v1709_v44  ;;  %v1015_v10 = vld [vmem:[%s2779_s7 + $0x70] sm:$0xff]  ;;  %v1020_v20 = vld [vmem:[%s2779_s7 + $0x98] sm:$0xff]  ;;  %v1740_v31 = vld [vmem:[%s2779_s7 + $0x2a8] sm:$0xff] }
 0x119   : > { %v2378_v39 = vpack.c.bf16 %v1202_v25, %v1200_v17  ;;  %1860 = vmatpush1.bf16.msra.mxu1 %v2358_v24  ;;  %v1930_v45 = vpop.eup %1929  ;;  %v1204_v46 = vadd.f32 %v1172_v34, %v1010_v27  ;;  %v1171_v48 = vmul.f32 %v1928_v38, %v1727_v28  ;;  %1947 = vpow2.f32 %v1108_v36  ;;  %v1018_v17 = vld [vmem:[%s2779_s7 + $0x88] sm:$0xff]  ;;  %v1737_v27 = vld [vmem:[%s2779_s7 + $0x290] sm:$0xff] }
 0x11a   : > { %v1932_v51 = vpop.eup %1931  ;;  %v2396_v52 = vpack.c.bf16 %v1201_v40, %v1199_v32  ;;  %v1206_v53 = vadd.f32 %v1174_v41, %v1012_v33  ;;  %v1173_v54 = vmul.f32 %v1930_v45, %v1729_v35  ;;  %1949 = vpow2.f32 %v1112_v50  ;;  %v1019_v35 = vld [vmem:[%s2779_s7 + $0x90] sm:$0xff]  ;;  %v1022_v40 = vld [vmem:[%s2779_s7 + $0xa8] sm:$0xff]  ;;  %v1742_v41 = vld [vmem:[%s2779_s7 + $0x2b8] sm:$0xff] }
 0x11b   : > { %1853 = vmatprep.subr.bf16.mxu1 %v2378_v39  ;;  %v1934_v60 = vpop.eup %1933  ;;  %v1203_v61 = vadd.f32 %v1171_v48, %v1009_v42  ;;  %v1176_v63 = vmul.f32 %v1932_v51, %v1732_v43  ;;  %1951 = vpow2.f32 %v1106_v58  ;;  %v1739_v45 = vld [vmem:[%s2779_s7 + $0x2a0] sm:$0xff]  ;;  %v1024_v48 = vld [vmem:[%s2779_s7 + $0xb8] sm:$0xff]  ;;  %v1023_v58 = vld [vmem:[%s2779_s7 + $0xb0] sm:$0xff] }
 0x11c   : > { %v1936_v2 = vpop.eup %1935  ;;  %v2411_v3 = vpack.c.bf16 %v1206_v53, %v1204_v46  ;;  %v1205_v4 = vadd.f32 %v1173_v54, %v1011_v47  ;;  %v1178_v5 = vmul.f32 %v1934_v60, %v1734_v49  ;;  %1953 = vpow2.f32 %v1110_v1  ;;  %v1741_v49 = vld [vmem:[%s2779_s7 + $0x2b0] sm:$0xff]  ;;  %v1021_v54 = vld [vmem:[%s2779_s7 + $0xa0] sm:$0xff] }
 0x11d   : > { %1861 = vmatpush1.bf16.msra.mxu1 %v2396_v52  ;;  %v1938_v8 = vpop.eup %1937  ;;  %v1208_v9 = vadd.f32 %v1176_v63, %v1014_v55  ;;  %v1175_v11 = vmul.f32 %v1936_v2, %v1731_v57 }
 0x11e   : > { %v1940_v13 = vpop.eup %1939  ;;  %v2426_v14 = vpack.c.bf16 %v1205_v4, %v1203_v61  ;;  %v1210_v15 = vadd.f32 %v1178_v5, %v1016_v62  ;;  %v1177_v16 = vmul.f32 %v1938_v8, %v1733_v0  ;;  %1854 = vmatprep.subr.bf16.mxu1 %v2411_v3  ;;  %v1651_v4 = vld [vmem:[%s2776_s4 + $0x1] sm:$0x1] }
 0x11f   : > { %v1942_v18 = vpop.eup %1941  ;;  %v1207_v19 = vadd.f32 %v1175_v11, %v1013_v6  ;;  %v1180_v21 = vmul.f32 %v1940_v13, %v1736_v7  ;;  %v618_v5 = vmul.f32 1.442695, %v1651_v4  ;;  %v1652_v7 = vld [vmem:[%s2776_s4 + $0x2] sm:$0x1] }
 0x120   : > { %v2438_v23 = vpack.c.bf16 %v1210_v15, %v1208_v9  ;;  %v1209_v25 = vadd.f32 %v1177_v16, %v1015_v10  ;;  %v1182_v26 = vmul.f32 %v1942_v18, %v1738_v12  ;;  %v615_v9 = vld [vmem:[%s2776_s4] sm:$0x1] }
 0x121   : > { %1862 = vmatpush1.bf16.msra.mxu1 %v2426_v14  ;;  %v1944_v28 = vpop.eup %1943  ;;  %v1212_v29 = vadd.f32 %v1180_v21, %v1018_v17  ;;  %1955 = vpow2.f32 %v618_v5 }
 0x122   : > { %v1946_v32 = vpop.eup %1945  ;;  %v2450_v33 = vpack.c.bf16 %v1209_v25, %v1207_v19  ;;  %v1214_v34 = vadd.f32 %v1182_v26, %v1020_v20  ;;  %v1179_v36 = vmul.f32 %v1944_v28, %v1735_v22  ;;  %1855 = vmatprep.subr.bf16.mxu1 %v2438_v23 }
 0x123   : > { %v1948_v37 = vpop.eup %1947  ;;  %v1181_v38 = vmul.f32 %v1946_v32, %v1737_v27 }
 0x124   : > { %v2462_v42 = vpack.c.bf16 %v1214_v34, %v1212_v29  ;;  %v1211_v43 = vadd.f32 %v1179_v36, %v1017_v30  ;;  %v1184_v44 = vmul.f32 %v1948_v37, %v1740_v31  ;;  %v1950_v46 = vpop.eup %1949 }
 0x125   : > { %1863 = vmatpush1.bf16.msra.mxu1 %v2450_v33  ;;  %v1213_v47 = vadd.f32 %v1181_v38, %v1019_v35  ;;  %v1952_v50 = vpop.eup %1951  ;;  %v1186_v51 = vmul.f32 %v1950_v46, %v1742_v41 }
 0x126   : > { %v1216_v53 = vadd.f32 %v1184_v44, %v1022_v40  ;;  %1856 = vmatprep.subr.bf16.mxu1 %v2462_v42  ;;  %v1954_v55 = vpop.eup %1953  ;;  %v1183_v60 = vmul.f32 %v1952_v50, %v1739_v45 }
 0x127   : > { %v2478_v57 = vpack.c.bf16 %v1213_v47, %v1211_v43  ;;  %v1218_v61 = vadd.f32 %v1186_v51, %v1024_v48  ;;  %v1185_v62 = vmul.f32 %v1954_v55, %v1741_v49 }
 0x128   : > { %v1215_v63 = vadd.f32 %v1183_v60, %v1021_v54 }
 0x129   : > { %1864 = vmatpush1.bf16.msra.mxu1 %v2478_v57  ;;  %v2484_v0 = vpack.c.bf16 %v1218_v61, %v1216_v53  ;;  %v1217_v1 = vadd.f32 %v1185_v62, %v1023_v58 }
 0x12b   : > { %v2486_v2 = vpack.c.bf16 %v1217_v1, %v1215_v63  ;;  %1857 = vmatprep.subr.bf16.mxu1 %v2484_v0  ;;  %v1956_v6 = vpop.eup %1955 }
 0x12c   : > { %v622_v8 = vmul.f32 %v1956_v6, %v1652_v7 }
 0x12d   : > { %1865 = vmatpush1.bf16.msra.mxu1 %v2486_v2 }
 0x12e   : > { %v623_v10 = vadd.f32 %v622_v8, %v615_v9  ;;  %v1712_v9 = vld [vmem:[%s2779_s7 + $0x1c8] sm:$0xff] }
 0x130   : > { %v2500_v11 = vrot.slane %v623_v10, %v2212_v59  ;;  %v1116_v10 = vmul.f32 1.442695, %v1712_v9 }
 0x132   : > { %1957 = vpow2.f32 %v1116_v10  ;;  %v1678_v10 = vld [vmem:[%s2778_s6 + $0x2] sm:$0x1] }
 0x1cf   : > { %v1814_v12 = vpop.f32.mrb[0].mxu1 }
 0x1d0   : > { %v708_v13 = vadd.f32 %v1814_v12, %v2500_v11  ;;  %v699_v15 = vpop.f32.mrb[1].mxu1 }
 0x1d1   : > { %v700_v16 = vadd.f32 %v699_v15, %v2500_v11  ;;  %v1815_v17 = vpop.f32.mrb[2].mxu1  ;;  %v1716_v15 = vld [vmem:[%s2779_s7 + $0x1e8] sm:$0xff] }
 0x1d2   : > { %v711_v18 = vadd.f32 %v1815_v17, %v2500_v11  ;;  %v702_v19 = vpop.f32.mrb[3].mxu1  ;;  %v764_v21 = vmax.f32 %v708_v13, 0.0  ;;  %v1124_v17 = vmul.f32 1.442695, %v1716_v15 }
 0x1d3   : > { %v703_v20 = vadd.f32 %v702_v19, %v2500_v11  ;;  %v762_v25 = vmax.f32 %v700_v16, 0.0  ;;  %v1718_v16 = vld [vmem:[%s2779_s7 + $0x1f8] sm:$0xff]  ;;  %v1715_v19 = vld [vmem:[%s2779_s7 + $0x1e0] sm:$0xff] }
 0x1d4   : > { %v765_v22 = vmax.f32 %v711_v18, 0.0  ;;  %v1128_v18 = vmul.f32 1.442695, %v1718_v16 }
 0x1d5   : > { %v763_v26 = vmax.f32 %v703_v20, 0.0  ;;  %v1717_v20 = vld [vmem:[%s2779_s7 + $0x1f0] sm:$0xff] }
 0x1d6   : > { %v846_v27 = vpack.c.bf16 %v765_v22, %v764_v21  ;;  %v1122_v21 = vmul.f32 1.442695, %v1715_v19  ;;  %v1126_v22 = vmul.f32 1.442695, %v1717_v20 }
 0x1d7   : > { %v845_v28 = vpack.c.bf16 %v763_v26, %v762_v25  ;;  %v1818_v29 = vpop.f32.mrb[4].mxu1  ;;  %v1958_v25 = vpop.eup %1957  ;;  %v1744_v26 = vld [vmem:[%s2779_s7 + $0x2c8] sm:$0xff] }
 0x1d8   : > { %v724_v30 = vadd.f32 %v1818_v29, %v2500_v11  ;;  %v715_v31 = vpop.f32.mrb[5].mxu1  ;;  %v1188_v29 = vmul.f32 %v1958_v25, %v1744_v26 }
 0x1d9   : > { %v716_v32 = vadd.f32 %v715_v31, %v2500_v11  ;;  %v1819_v34 = vpop.f32.mrb[6].mxu1  ;;  %1836 = vmatprep.mubr.msk.bf16.mxu0 %vm863_vm2, %v845_v28  ;;  %v1745_v31 = vld [vmem:[%s2779_s7 + $0x2d0] sm:$0xff] }
 0x1da   : > { %v727_v35 = vadd.f32 %v1819_v34, %v2500_v11  ;;  %v718_v36 = vpop.f32.mrb[7].mxu1  ;;  %1837 = vmatmul.mubr.msk.bf16.vlgmr.msra.gmra.mrb[16].mxu0 %vm863_vm2, %v846_v27  ;;  %v768_v38 = vmax.f32 %v724_v30, 0.0  ;;  %v1746_v27 = vld [vmem:[%s2779_s7 + $0x2d8] sm:$0xff]  ;;  %v1743_v30 = vld [vmem:[%s2779_s7 + $0x2c0] sm:$0xff]  ;;  %v1026_v34 = vld [vmem:[%s2779_s7 + $0xc8] sm:$0xff] }
 0x1db   : > { %v719_v37 = vadd.f32 %v718_v36, %v2500_v11  ;;  %1272 = vmatpush1.bf16.msra.mxu0 %v2358_v24  ;;  %v766_v41 = vmax.f32 %v716_v32, 0.0 }
 0x1dc   : > { %v769_v40 = vmax.f32 %v727_v35, 0.0  ;;  %1273 = vmatprep.subr.bf16.mxu0 %v2378_v39  ;;  %v1028_v35 = vld [vmem:[%s2779_s7 + $0xd8] sm:$0xff] }
 0x1dd   : > { %v767_v43 = vmax.f32 %v719_v37, 0.0 }
 0x1de   : > { %v848_v44 = vpack.c.bf16 %v769_v40, %v768_v38  ;;  %v1220_v38 = vadd.f32 %v1188_v29, %v1026_v34  ;;  %v1025_v40 = vld [vmem:[%s2779_s7 + $0xc0] sm:$0xff] }
 0x1df   : > { %v847_v45 = vpack.c.bf16 %v767_v43, %v766_v41  ;;  %v1822_v46 = vpop.f32.mrb[8].mxu1  ;;  %1274 = vmatpush1.bf16.msra.mxu0 %v2396_v52  ;;  %v1027_v41 = vld [vmem:[%s2779_s7 + $0xd0] sm:$0xff] }
 0x1e0   : > { %v740_v47 = vadd.f32 %v1822_v46, %v2500_v11  ;;  %v731_v48 = vpop.f32.mrb[9].mxu1  ;;  %1275 = vmatprep.subr.bf16.mxu0 %v2411_v3 }
 0x1e1   : > { %v732_v49 = vadd.f32 %v731_v48, %v2500_v11  ;;  %v1823_v50 = vpop.f32.mrb[10].mxu1  ;;  %1840 = vmatprep.mubr.msk.bf16.mxu0 %vm863_vm2, %v847_v45  ;;  %v1750_v48 = vld [vmem:[%s2779_s7 + $0x2f8] sm:$0xff] }
 0x1e2   : > { %v772_v24 = vmax.f32 %v740_v47, 0.0  ;;  %v743_v39 = vadd.f32 %v1823_v50, %v2500_v11  ;;  %v734_v51 = vpop.f32.mrb[11].mxu1  ;;  %1841 = vmatmul.mubr.msk.bf16.gmra.mrb[20].mxu0 %vm863_vm2, %v848_v44  ;;  %v1748_v47 = vld [vmem:[%s2779_s7 + $0x2e8] sm:$0xff] }
 0x1e3   : > { %v770_v53 = vmax.f32 %v732_v49, 0.0  ;;  %v735_v54 = vadd.f32 %v734_v51, %v2500_v11  ;;  %1276 = vmatpush1.bf16.msra.mxu0 %v2426_v14  ;;  %v1749_v51 = vld [vmem:[%s2779_s7 + $0x2f0] sm:$0xff] }
 0x1e4   : > { %v773_v52 = vmax.f32 %v743_v39, 0.0  ;;  %1277 = vmatprep.subr.bf16.mxu0 %v2438_v23  ;;  %v1747_v39 = vld [vmem:[%s2779_s7 + $0x2e0] sm:$0xff] }
 0x1e5   : > { %v771_v3 = vmax.f32 %v735_v54, 0.0 }
 0x1e6   : > { %v850_v55 = vpack.c.bf16 %v773_v52, %v772_v24 }
 0x1e7   : > { %v849_v58 = vpack.c.bf16 %v771_v3, %v770_v53  ;;  %v1826_v60 = vpop.f32.mrb[12].mxu1  ;;  %1278 = vmatpush1.bf16.msra.mxu0 %v2450_v33  ;;  %v1030_v3 = vld [vmem:[%s2779_s7 + $0xe8] sm:$0xff] }
 0x1e8   : > { %v756_v61 = vadd.f32 %v1826_v60, %v2500_v11  ;;  %v747_v62 = vpop.f32.mrb[13].mxu1  ;;  %1279 = vmatprep.subr.bf16.mxu0 %v2462_v42 }
 0x1e9   : > { %1844 = vmatprep.mubr.msk.bf16.mxu0 %vm863_vm2, %v849_v58  ;;  %v748_v63 = vadd.f32 %v747_v62, %v2500_v11  ;;  %v1827_v1 = vpop.f32.mrb[14].mxu1  ;;  %v1029_v62 = vld [vmem:[%s2779_s7 + $0xe0] sm:$0xff] }
 0x1ea   : > { %1845 = vmatmul.mubr.msk.bf16.gmra.mrb[24].mxu0 %vm863_vm2, %v850_v55  ;;  %v776_v14 = vmax.f32 %v756_v61, 0.0  ;;  %v759_v23 = vadd.f32 %v1827_v1, %v2500_v11  ;;  %v750_v4 = vpop.f32.mrb[15].mxu1  ;;  %v1032_v55 = vld [vmem:[%s2779_s7 + $0xf8] sm:$0xff] }
 0x1eb   : > { %v774_v5 = vmax.f32 %v748_v63, 0.0  ;;  %v751_v6 = vadd.f32 %v750_v4, %v2500_v11  ;;  %1280 = vmatpush1.bf16.msra.mxu0 %v2478_v57  ;;  %v1714_v57 = vld [vmem:[%s2779_s7 + $0x1d8] sm:$0xff]  ;;  %v1031_v63 = vld [vmem:[%s2779_s7 + $0xf0] sm:$0xff] }
 0x1ec   : > { %v777_v33 = vmax.f32 %v759_v23, 0.0  ;;  %1281 = vmatprep.subr.bf16.mxu0 %v2484_v0  ;;  %v1120_v11 = vmul.f32 1.442695, %v1714_v57  ;;  %v1711_v0 = vld [vmem:[%s2779_s7 + $0x1c0] sm:$0xff] }
 0x1ed   : > { %v775_v42 = vmax.f32 %v751_v6, 0.0  ;;  %v1114_v12 = vmul.f32 1.442695, %v1711_v0  ;;  %v836_v0 = vld [vmem:[%s2778_s6] sm:$0x1] }
 0x1ee   : > { %v852_v7 = vpack.c.bf16 %v777_v33, %v776_v14  ;;  %1959 = vpow2.f32 %v1120_v11 }
 0x1ef   : > { %v851_v8 = vpack.c.bf16 %v775_v42, %v774_v5  ;;  %1282 = vmatpush1.bf16.msra.mxu0 %v2486_v2  ;;  %v1713_v2 = vld [vmem:[%s2779_s7 + $0x1d0] sm:$0xff]  ;;  %1961 = vpow2.f32 %v1114_v12 }
 0x1f0   : > { %v1118_v13 = vmul.f32 1.442695, %v1713_v2 }
 0x1f1   : > { %1848 = vmatprep.mubr.msk.bf16.mxu0 %vm863_vm2, %v851_v8  ;;  %v1677_v8 = vld [vmem:[%s2778_s6 + $0x1] sm:$0x1] }
 0x1f2   : > { %1849 = vmatmul.mubr.msk.bf16.gmra.mrb[28].mxu0 %vm863_vm2, %v852_v7  ;;  %1963 = vpow2.f32 %v1118_v13  ;;  %v1989_v7 = vmov 0   ;;  %v839_v9 = vmul.f32 1.442695, %v1677_v8 }
 0x1f3   : > { %1965 = vpow2.f32 %v1124_v17  ;;  %1303 = vmatprep.mubr.bf16.mxu0 %v1989_v7  ;;  %1323 = vmatprep.mubr.bf16.mxu1 %v1989_v7 }
 0x1f4   : > { %1967 = vpow2.f32 %v1128_v18 }
 0x1f5   : > { %1969 = vpow2.f32 %v1122_v21 }
 0x1f6   : > { %1971 = vpow2.f32 %v1126_v22 }
 0x1f7   : > { %1973 = vpow2.f32 %v839_v9 }
 0x1f8   : > { %v1960_v28 = vpop.eup %1959 }
 0x1f9   : > { %v1962_v32 = vpop.eup %1961  ;;  %v1190_v36 = vmul.f32 %v1960_v28, %v1746_v27 }
 0x1fa   : > { %v1187_v43 = vmul.f32 %v1962_v32, %v1743_v30 }
 0x1fb   : > { %v1222_v45 = vadd.f32 %v1190_v36, %v1028_v35 }
 0x1fc   : > { %v1964_v37 = vpop.eup %1963  ;;  %v1219_v50 = vadd.f32 %v1187_v43, %v1025_v40 }
 0x1fd   : > { %v1966_v44 = vpop.eup %1965  ;;  %v1189_v46 = vmul.f32 %v1964_v37, %v1745_v31  ;;  %v1257_v54 = vpack.c.bf16 %v1222_v45, %v1220_v38 }
 0x1fe   : > { %v1968_v49 = vpop.eup %1967  ;;  %v1192_v24 = vmul.f32 %v1966_v44, %v1748_v47 }
 0x1ff   : > { %v1970_v53 = vpop.eup %1969  ;;  %v1221_v52 = vadd.f32 %v1189_v46, %v1027_v41  ;;  %v1194_v58 = vmul.f32 %v1968_v49, %v1750_v48  ;;  %1283 = vmatprep.subr.bf16.mxu0 %v1257_v54  ;;  %1858 = vmatprep.subr.bf16.mxu1 %v1257_v54 }
 0x200   : > { %v1972_v60 = vpop.eup %1971  ;;  %v1224_v61 = vadd.f32 %v1192_v24, %v1030_v3  ;;  %v1191_v1 = vmul.f32 %v1970_v53, %v1747_v39 }
 0x201   : > { %v1256_v14 = vpack.c.bf16 %v1221_v52, %v1219_v50  ;;  %v1226_v23 = vadd.f32 %v1194_v58, %v1032_v55  ;;  %v1193_v4 = vmul.f32 %v1972_v60, %v1749_v51  ;;  %v1974_v57 = vpop.eup %1973 }
 0x202   : > { %v1223_v5 = vadd.f32 %v1191_v1, %v1029_v62  ;;  %v843_v11 = vmul.f32 %v1974_v57, %v1678_v10  ;;  %v1751_v10 = vld [vmem:[%s2780_s8 + $0x2] sm:$0x3] }
 0x203   : > { %1284 = vmatpush1.bf16.msra.mxu0 %v1256_v14  ;;  %v1259_v6 = vpack.c.bf16 %v1226_v23, %v1224_v61  ;;  %v1225_v33 = vadd.f32 %v1193_v4, %v1031_v63  ;;  %1866 = vmatpush1.bf16.msra.mxu1 %v1256_v14 }
 0x204   : > { %v844_v2 = vadd.f32 %v843_v11, %v836_v0  ;;  %v1230_v11 = vmul.f32 1.442695, %v1751_v10  ;;  %v1753_v0 = vld [vmem:[%s2781_s9 + $0x2] sm:$0x3] }
 0x205   : > { %1285 = vmatprep.subr.bf16.mxu0 %v1259_v6  ;;  %v1258_v42 = vpack.c.bf16 %v1225_v33, %v1223_v5  ;;  %1859 = vmatprep.subr.bf16.mxu1 %v1259_v6 }
 0x206   : > { %v861_v12 = vrot.slane %v844_v2, %v2212_v59  ;;  %1975 = vpow2.f32 %v1230_v11  ;;  %v1419_v2 = vmul.f32 1.442695, %v1753_v0 }
 0x207   : > { %1286 = vmatpush1.bf16.msra.mxu0 %v1258_v42  ;;  %1867 = vmatpush1.bf16.msra.mxu1 %v1258_v42 }
 0x208   : > { %1977 = vpow2.f32 %v1419_v2 }
 0x2ad   : > { %v1838_v13 = vpop.f32.mrb[16].mxu0 }
 0x2ae   : > { %v931_v15 = vadd.f32 %v1838_v13, %v861_v12  ;;  %v922_v16 = vpop.f32.mrb[17].mxu0  ;;  %v1752_v13 = vld [vmem:[%s2780_s8 + $0x4] sm:$0x3] }
 0x2af   : > { %v923_v17 = vadd.f32 %v922_v16, %v861_v12  ;;  %v1839_v18 = vpop.f32.mrb[18].mxu0  ;;  %v1227_v16 = vld [vmem:[%s2780_s8] sm:$0x3] }
 0x2b0   : > { %v934_v19 = vadd.f32 %v1839_v18, %v861_v12  ;;  %v925_v20 = vpop.f32.mrb[19].mxu0  ;;  %v987_v22 = vmax.f32 %v931_v15, 0.0 }
 0x2b1   : > { %v926_v21 = vadd.f32 %v925_v20, %v861_v12  ;;  %v985_v26 = vmax.f32 %v923_v17, 0.0  ;;  %v1754_v17 = vld [vmem:[%s2781_s9 + $0x4] sm:$0x3]  ;;  %v1267_v20 = vsub.s32 1, %v2206_v56 }
 0x2b2   : > { %v988_v25 = vmax.f32 %v934_v19, 0.0 }
 0x2b3   : > { %v986_v27 = vmax.f32 %v926_v21, 0.0  ;;  %v1416_v21 = vld [vmem:[%s2781_s9] sm:$0x3] }
 0x2b4   : > { %v1237_v28 = vpack.c.bf16 %v988_v25, %v987_v22 }
 0x2b5   : > { %v1236_v29 = vpack.c.bf16 %v986_v27, %v985_v26  ;;  %v1842_v30 = vpop.f32.mrb[20].mxu0 }
 0x2b6   : > { %v947_v31 = vadd.f32 %v1842_v30, %v861_v12  ;;  %v938_v32 = vpop.f32.mrb[21].mxu0 }
 0x2b7   : > { %v939_v34 = vadd.f32 %v938_v32, %v861_v12  ;;  %v1843_v35 = vpop.f32.mrb[22].mxu0  ;;  %1304 = vmatmul.mubr.bf16.vlgmr.msra.gmra.mrb[32].mxu0 %v1236_v29 }
 0x2b8   : > { %v950_v36 = vadd.f32 %v1843_v35, %v861_v12  ;;  %v941_v37 = vpop.f32.mrb[23].mxu0  ;;  %1313 = vmatprep.mubr.bf16.mxu0 %v1989_v7  ;;  %v991_v40 = vmax.f32 %v947_v31, 0.0 }
 0x2b9   : > { %v942_v38 = vadd.f32 %v941_v37, %v861_v12  ;;  %v989_v43 = vmax.f32 %v939_v34, 0.0 }
 0x2ba   : > { %v992_v41 = vmax.f32 %v950_v36, 0.0 }
 0x2bb   : > { %v990_v44 = vmax.f32 %v942_v38, 0.0 }
 0x2bc   : > { %v1239_v45 = vpack.c.bf16 %v992_v41, %v991_v40 }
 0x2bd   : > { %v1238_v46 = vpack.c.bf16 %v990_v44, %v989_v43  ;;  %v1846_v47 = vpop.f32.mrb[24].mxu0 }
 0x2be   : > { %v963_v48 = vadd.f32 %v1846_v47, %v861_v12  ;;  %v954_v49 = vpop.f32.mrb[25].mxu0 }
 0x2bf   : > { %v955_v50 = vadd.f32 %v954_v49, %v861_v12  ;;  %v1847_v24 = vpop.f32.mrb[26].mxu0  ;;  %1314 = vmatmul.mubr.bf16.gmra.mrb[36].mxu0 %v1237_v28  ;;  %1324 = vmatmul.mubr.bf16.vlgmr.msra.gmra.mrb[16].mxu1 %v1238_v46 }
 0x2c0   : > { %v966_v39 = vadd.f32 %v1847_v24, %v861_v12  ;;  %v957_v51 = vpop.f32.mrb[27].mxu0  ;;  %1333 = vmatprep.mubr.bf16.mxu1 %v1989_v7  ;;  %v995_v54 = vmax.f32 %v963_v48, 0.0 }
 0x2c1   : > { %v958_v53 = vadd.f32 %v957_v51, %v861_v12  ;;  %v993_v3 = vmax.f32 %v955_v50, 0.0 }
 0x2c2   : > { %v996_v52 = vmax.f32 %v966_v39, 0.0 }
 0x2c3   : > { %v994_v55 = vmax.f32 %v958_v53, 0.0 }
 0x2c4   : > { %v1241_v58 = vpack.c.bf16 %v996_v52, %v995_v54 }
 0x2c5   : > { %v1240_v60 = vpack.c.bf16 %v994_v55, %v993_v3  ;;  %v1850_v61 = vpop.f32.mrb[28].mxu0 }
 0x2c6   : > { %v979_v62 = vadd.f32 %v1850_v61, %v861_v12  ;;  %v970_v63 = vpop.f32.mrb[29].mxu0 }
 0x2c7   : > { %1334 = vmatmul.mubr.bf16.gmra.mrb[20].mxu1 %v1239_v45  ;;  %v971_v1 = vadd.f32 %v970_v63, %v861_v12  ;;  %v1851_v14 = vpop.f32.mrb[30].mxu0 }
 0x2c8   : > { %v999_v23 = vmax.f32 %v979_v62, 0.0  ;;  %v982_v4 = vadd.f32 %v1851_v14, %v861_v12  ;;  %v973_v5 = vpop.f32.mrb[31].mxu0  ;;  %1343 = vmatprep.mubr.bf16.mxu1 %v1989_v7 }
 0x2c9   : > { %v997_v6 = vmax.f32 %v971_v1, 0.0  ;;  %v974_v33 = vadd.f32 %v973_v5, %v861_v12  ;;  %v1976_v12 = vpop.eup %1975 }
 0x2ca   : > { %v1000_v42 = vmax.f32 %v982_v4, 0.0  ;;  %v1234_v15 = vmul.f32 %v1976_v12, %v1752_v13 }
 0x2cb   : > { %v998_v8 = vmax.f32 %v974_v33, 0.0 }
 0x2cc   : > { %v1243_v9 = vpack.c.bf16 %v1000_v42, %v999_v23  ;;  %v1235_v18 = vadd.f32 %v1234_v15, %v1227_v16 }
 0x2cd   : > { %v1242_v57 = vpack.c.bf16 %v998_v8, %v997_v6 }
 0x2ce   : > { %v2647_v22 = vrot.slane %v1235_v18, %v2212_v59  ;;  %v2649_v26 = vrot.slane %v1235_v18, %v1267_v20 }
 0x2cf   : > { %1344 = vmatmul.mubr.bf16.gmra.mrb[24].mxu1 %v1240_v60 }
 0x2d0   : > { %1353 = vmatprep.mubr.bf16.mxu1 %v1989_v7 }
 0x2d7   : > { %1354 = vmatmul.mubr.bf16.gmra.mrb[28].mxu1 %v1241_v58 }
 0x2d8   : > { %1363 = vmatprep.mubr.bf16.mxu1 %v1989_v7 }
 0x2df   : > { %1364 = vmatmul.mubr.bf16.gmra.mrb[32].mxu1 %v1242_v57 }
 0x2e0   : > { %1373 = vmatprep.mubr.bf16.mxu1 %v1989_v7  ;;  %v1978_v7 = vpop.eup %1977 }
 0x2e1   : > { %v1423_v19 = vmul.f32 %v1978_v7, %v1754_v17 }
 0x2e3   : > { %v1424_v25 = vadd.f32 %v1423_v19, %v1416_v21 }
 0x2e5   : > { %v2653_v30 = vrot.slane %v1424_v25, %v2212_v59  ;;  %v2656_v32 = vrot.slane %v1424_v25, %v1267_v20 }
 0x2e7   : > { %1374 = vmatmul.mubr.bf16.gmra.mrb[36].mxu1 %v1243_v9 }
 0x38a   : > { %v1305_v27 = vpop.f32.mrb[32].mxu0 }
 0x38b   : > { %v1306_v28 = vadd.f32 %v1305_v27, %v2647_v22  ;;  %v1307_v29 = vpop.f32.mrb[33].mxu0 }
 0x38c   : > { %v1308_v31 = vadd.f32 %v1307_v29, %v2649_v26  ;;  %v1309_v56 = vpop.f32.mrb[34].mxu0 }
 0x38d   : > { %v1384_v34 = vmax.f32 %v1306_v28, 0.0  ;;  %v1310_v35 = vadd.f32 %v1309_v56, %v2647_v22  ;;  %v1311_v36 = vpop.f32.mrb[35].mxu0 }
 0x38e   : > { %v1385_v37 = vmax.f32 %v1308_v31, 0.0  ;;  %v1312_v38 = vadd.f32 %v1311_v36, %v2649_v26 }
 0x38f   : > { %v1386_v40 = vmax.f32 %v1310_v35, 0.0  ;;  %v1445_v41 = vmul.f32 %v2653_v30, %v1384_v34 }
 0x390   : > { %v1387_v43 = vmax.f32 %v1312_v38, 0.0  ;;  %v1446_v44 = vmul.f32 %v2656_v32, %v1385_v37 }
 0x391   : > { %v1447_v45 = vmul.f32 %v2653_v30, %v1386_v40 }
 0x392   : > { %v1448_v46 = vmul.f32 %v2656_v32, %v1387_v43  ;;  %v1315_v47 = vpop.f32.mrb[36].mxu0  ;;  %v1325_v48 = vpop.f32.mrb[16].mxu1  ;;  %v1477_v49 = vadd.f32 %v1446_v44, %v1445_v41 }
 0x393   : > { %v1316_v50 = vadd.f32 %v1315_v47, %v2647_v22  ;;  %v1326_v24 = vadd.f32 %v1325_v48, %v2647_v22  ;;  %v1317_v39 = vpop.f32.mrb[37].mxu0  ;;  %v1327_v51 = vpop.f32.mrb[17].mxu1 }
 0x394   : > { %v1318_v53 = vadd.f32 %v1317_v39, %v2649_v26  ;;  %v1328_v54 = vadd.f32 %v1327_v51, %v2649_v26  ;;  %v1319_v52 = vpop.f32.mrb[38].mxu0  ;;  %v1329_v3 = vpop.f32.mrb[18].mxu1  ;;  %1478 = vadd.xlane.f32.xlu0 %v1477_v49  ;;  %v1480_v55 = vadd.f32 %v1448_v46, %v1447_v45 }
 0x395   : > { %v1388_v58 = vmax.f32 %v1316_v50, 0.0  ;;  %v1392_v60 = vmax.f32 %v1326_v24, 0.0  ;;  %v1320_v61 = vadd.f32 %v1319_v52, %v2647_v22  ;;  %v1330_v62 = vadd.f32 %v1329_v3, %v2647_v22  ;;  %v1321_v63 = vpop.f32.mrb[39].mxu0  ;;  %v1331_v1 = vpop.f32.mrb[19].mxu1 }
 0x396   : > { %v1389_v14 = vmax.f32 %v1318_v53, 0.0  ;;  %v1393_v23 = vmax.f32 %v1328_v54, 0.0  ;;  %v1322_v4 = vadd.f32 %v1321_v63, %v2649_v26  ;;  %v1332_v5 = vadd.f32 %v1331_v1, %v2649_v26 }
 0x397   : > { %v1453_v6 = vmul.f32 %v2653_v30, %v1392_v60  ;;  %v1390_v33 = vmax.f32 %v1320_v61, 0.0  ;;  %v1394_v42 = vmax.f32 %v1330_v62, 0.0  ;;  %v1449_v8 = vmul.f32 %v2653_v30, %v1388_v58 }
 0x398   : > { %v1454_v9 = vmul.f32 %v2656_v32, %v1393_v23  ;;  %v1391_v57 = vmax.f32 %v1322_v4, 0.0  ;;  %v1395_v10 = vmax.f32 %v1332_v5, 0.0  ;;  %1481 = vadd.xlane.f32.xlu0 %v1480_v55  ;;  %v1450_v11 = vmul.f32 %v2656_v32, %v1389_v14 }
 0x399   : > { %v1451_v0 = vmul.f32 %v2653_v30, %v1390_v33  ;;  %v1455_v2 = vmul.f32 %v2653_v30, %v1394_v42 }
 0x39a   : > { %v1452_v12 = vmul.f32 %v2656_v32, %v1391_v57  ;;  %v1456_v13 = vmul.f32 %v2656_v32, %v1395_v10  ;;  %v1335_v15 = vpop.f32.mrb[20].mxu1  ;;  %v1483_v7 = vadd.f32 %v1450_v11, %v1449_v8  ;;  %v1489_v16 = vadd.f32 %v1454_v9, %v1453_v6 }
 0x39b   : > { %v1336_v17 = vadd.f32 %v1335_v15, %v2647_v22  ;;  %v1337_v18 = vpop.f32.mrb[21].mxu1 }
 0x39c   : > { %v1338_v19 = vadd.f32 %v1337_v18, %v2649_v26  ;;  %v1339_v20 = vpop.f32.mrb[22].mxu1  ;;  %1484 = vadd.xlane.f32.xlu1 %v1483_v7  ;;  %1490 = vadd.xlane.f32.xlu0 %v1489_v16  ;;  %v1486_v21 = vadd.f32 %v1452_v12, %v1451_v0  ;;  %v1492_v25 = vadd.f32 %v1456_v13, %v1455_v2 }
 0x39d   : > { %v1396_v27 = vmax.f32 %v1336_v17, 0.0  ;;  %v1340_v28 = vadd.f32 %v1339_v20, %v2647_v22  ;;  %v1341_v29 = vpop.f32.mrb[23].mxu1 }
 0x39e   : > { %v1397_v31 = vmax.f32 %v1338_v19, 0.0  ;;  %v1342_v56 = vadd.f32 %v1341_v29, %v2649_v26 }
 0x39f   : > { %v1457_v34 = vmul.f32 %v2653_v30, %v1396_v27  ;;  %v1398_v35 = vmax.f32 %v1340_v28, 0.0 }
 0x3a0   : > { %v1458_v36 = vmul.f32 %v2656_v32, %v1397_v31  ;;  %v1399_v37 = vmax.f32 %v1342_v56, 0.0  ;;  %1487 = vadd.xlane.f32.xlu1 %v1486_v21 }
 0x3a1   : > { %v1459_v38 = vmul.f32 %v2653_v30, %v1398_v35 }
 0x3a2   : > { %v1460_v40 = vmul.f32 %v2656_v32, %v1399_v37  ;;  %v1345_v41 = vpop.f32.mrb[24].mxu1  ;;  %v1495_v43 = vadd.f32 %v1458_v36, %v1457_v34 }
 0x3a3   : > { %v1346_v44 = vadd.f32 %v1345_v41, %v2647_v22  ;;  %v1347_v45 = vpop.f32.mrb[25].mxu1 }
 0x3a4   : > { %v1348_v46 = vadd.f32 %v1347_v45, %v2649_v26  ;;  %v1349_v47 = vpop.f32.mrb[26].mxu1  ;;  %1493 = vadd.xlane.f32.xlu1 %v1492_v25  ;;  %1496 = vadd.xlane.f32.xlu0 %v1495_v43  ;;  %v1498_v48 = vadd.f32 %v1460_v40, %v1459_v38 }
 0x3a5   : > { %v1400_v49 = vmax.f32 %v1346_v44, 0.0  ;;  %v1350_v50 = vadd.f32 %v1349_v47, %v2647_v22  ;;  %v1351_v24 = vpop.f32.mrb[27].mxu1 }
 0x3a6   : > { %v1401_v39 = vmax.f32 %v1348_v46, 0.0  ;;  %v1352_v51 = vadd.f32 %v1351_v24, %v2649_v26 }
 0x3a7   : > { %v1461_v53 = vmul.f32 %v2653_v30, %v1400_v49  ;;  %v1402_v54 = vmax.f32 %v1350_v50, 0.0 }
 0x3a8   : > { %v1462_v52 = vmul.f32 %v2656_v32, %v1401_v39  ;;  %v1403_v3 = vmax.f32 %v1352_v51, 0.0  ;;  %1499 = vadd.xlane.f32.xlu1 %v1498_v48 }
 0x3a9   : > { %v1463_v55 = vmul.f32 %v2653_v30, %v1402_v54 }
 0x3aa   : > { %v1464_v58 = vmul.f32 %v2656_v32, %v1403_v3  ;;  %v1355_v60 = vpop.f32.mrb[28].mxu1  ;;  %v1501_v61 = vadd.f32 %v1462_v52, %v1461_v53 }
 0x3ab   : > { %v1356_v62 = vadd.f32 %v1355_v60, %v2647_v22  ;;  %v1357_v63 = vpop.f32.mrb[29].mxu1 }
 0x3ac   : > { %v1358_v1 = vadd.f32 %v1357_v63, %v2649_v26  ;;  %v1359_v14 = vpop.f32.mrb[30].mxu1  ;;  %1502 = vadd.xlane.f32.xlu0 %v1501_v61  ;;  %v1504_v23 = vadd.f32 %v1464_v58, %v1463_v55  ;;  %v1756_v55 = vld [vmem:[%s2782_s10 + $0x2] sm:$0x1] }
 0x3ad   : > { %v1404_v4 = vmax.f32 %v1356_v62, 0.0  ;;  %v1360_v5 = vadd.f32 %v1359_v14, %v2647_v22  ;;  %v1361_v6 = vpop.f32.mrb[31].mxu1 }
 0x3ae   : > { %v1405_v33 = vmax.f32 %v1358_v1, 0.0  ;;  %v1362_v42 = vadd.f32 %v1361_v6, %v2649_v26  ;;  %1505 = vadd.xlane.f32.xlu1 %v1504_v23 }
 0x3af   : > { %v1465_v8 = vmul.f32 %v2653_v30, %v1404_v4  ;;  %v1406_v9 = vmax.f32 %v1360_v5, 0.0 }
 0x3b0   : > { %v1466_v57 = vmul.f32 %v2656_v32, %v1405_v33  ;;  %v1407_v10 = vmax.f32 %v1362_v42, 0.0 }
 0x3b1   : > { %v1467_v11 = vmul.f32 %v2653_v30, %v1406_v9 }
 0x3b2   : > { %v1468_v0 = vmul.f32 %v2656_v32, %v1407_v10  ;;  %v1365_v2 = vpop.f32.mrb[32].mxu1  ;;  %v1507_v12 = vadd.f32 %v1466_v57, %v1465_v8 }
 0x3b3   : > { %v1366_v13 = vadd.f32 %v1365_v2, %v2647_v22  ;;  %v1367_v15 = vpop.f32.mrb[33].mxu1 }
 0x3b4   : > { %v1368_v7 = vadd.f32 %v1367_v15, %v2649_v26  ;;  %v1369_v16 = vpop.f32.mrb[34].mxu1  ;;  %1508 = vadd.xlane.f32.xlu0 %v1507_v12  ;;  %v1510_v17 = vadd.f32 %v1468_v0, %v1467_v11 }
 0x3b5   : > { %v1408_v18 = vmax.f32 %v1366_v13, 0.0  ;;  %v1370_v19 = vadd.f32 %v1369_v16, %v2647_v22  ;;  %v1371_v20 = vpop.f32.mrb[35].mxu1 }
 0x3b6   : > { %v1409_v21 = vmax.f32 %v1368_v7, 0.0  ;;  %v1372_v25 = vadd.f32 %v1371_v20, %v2649_v26  ;;  %1511 = vadd.xlane.f32.xlu1 %v1510_v17 }
 0x3b7   : > { %v1469_v27 = vmul.f32 %v2653_v30, %v1408_v18  ;;  %v1410_v28 = vmax.f32 %v1370_v19, 0.0 }
 0x3b8   : > { %v1470_v29 = vmul.f32 %v2656_v32, %v1409_v21  ;;  %v1411_v31 = vmax.f32 %v1372_v25, 0.0 }
 0x3b9   : > { %v1471_v56 = vmul.f32 %v2653_v30, %v1410_v28 }
 0x3ba   : > { %v1472_v34 = vmul.f32 %v2656_v32, %v1411_v31  ;;  %v1375_v35 = vpop.f32.mrb[36].mxu1  ;;  %v1513_v36 = vadd.f32 %v1470_v29, %v1469_v27 }
 0x3bb   : > { %v1376_v37 = vadd.f32 %v1375_v35, %v2647_v22  ;;  %v1377_v38 = vpop.f32.mrb[37].mxu1 }
 0x3bc   : > { %v1378_v40 = vadd.f32 %v1377_v38, %v2649_v26  ;;  %v1379_v41 = vpop.f32.mrb[38].mxu1  ;;  %1514 = vadd.xlane.f32.xlu0 %v1513_v36  ;;  %v1516_v43 = vadd.f32 %v1472_v34, %v1471_v56 }
 0x3bd   : > { %v1412_v44 = vmax.f32 %v1376_v37, 0.0  ;;  %v1380_v45 = vadd.f32 %v1379_v41, %v2647_v22  ;;  %v1381_v46 = vpop.f32.mrb[39].mxu1  ;;  %v1755_v22 = vld [vmem:[%s2782_s10 + $0x1] sm:$0x1] }
 0x3be   : > { %v1413_v47 = vmax.f32 %v1378_v40, 0.0  ;;  %v1382_v48 = vadd.f32 %v1381_v46, %v2649_v26  ;;  %1517 = vadd.xlane.f32.xlu1 %v1516_v43  ;;  %v1428_v26 = vmul.f32 1.442695, %v1755_v22 }
 0x3bf   : > { %v1473_v49 = vmul.f32 %v2653_v30, %v1412_v44  ;;  %v1414_v50 = vmax.f32 %v1380_v45, 0.0 }
 0x3c0   : > { %v1474_v24 = vmul.f32 %v2656_v32, %v1413_v47  ;;  %v1415_v39 = vmax.f32 %v1382_v48, 0.0  ;;  %1979 = vpow2.f32 %v1428_v26 }
 0x3c1   : > { %v1475_v51 = vmul.f32 %v2653_v30, %v1414_v50  ;;  %v1425_v30 = vld [vmem:[%s2782_s10] sm:$0x1] }
 0x3c2   : > { %v1476_v53 = vmul.f32 %v2656_v32, %v1415_v39  ;;  %v1519_v54 = vadd.f32 %v1474_v24, %v1473_v49 }
 0x3c4   : > { %1520 = vadd.xlane.f32.xlu0 %v1519_v54  ;;  %v1522_v52 = vadd.f32 %v1476_v53, %v1475_v51 }
 0x3c6   : > { %1523 = vadd.xlane.f32.xlu1 %v1522_v52 }
 0x3ca   : > { %v1980_v3 = vpop.eup %1979 }
 0x3cb   : > { %v1432_v58 = vmul.f32 %v1980_v3, %v1756_v55 }
 0x3cd   : > { %v1433_v32 = vadd.f32 %v1432_v58, %v1425_v30 }
 0x3cf   : > { %v1529_v60 = vrot.slane %v1433_v32, %v2212_v59 }
 0x421   : > { %v1479_v61 = vpop.xlane.xlu0 %1478 }
 0x422   : > { %v1531_v62 = vadd.f32 %v1529_v60, %v1479_v61 }
 0x424   : > { %1548 = vst.msk [vmem:[%s2735_s15] sm:$0xff] %vm1547_vm3, %v1531_v62 }
 0x425   : > { %v1482_v63 = vpop.xlane.xlu0 %1481 }
 0x426   : > { %v1532_v1 = vadd.f32 %v1529_v60, %v1482_v63 }
 0x428   : > { %1549 = vst.msk [vmem:[%s2735_s15 + $0x8] sm:$0xff] %vm1547_vm3, %v1532_v1 }
 0x429   : > { %v1485_v59 = vpop.xlane.xlu1 %1484  ;;  %v1491_v14 = vpop.xlane.xlu0 %1490 }
 0x42a   : > { %v1533_v23 = vadd.f32 %v1529_v60, %v1485_v59  ;;  %v1535_v4 = vadd.f32 %v1529_v60, %v1491_v14 }
 0x42c   : > { %1550 = vst.msk [vmem:[%s2735_s15 + $0x10] sm:$0xff] %vm1547_vm3, %v1533_v23  ;;  %1552 = vst.msk [vmem:[%s2735_s15 + $0x20] sm:$0xff] %vm1547_vm3, %v1535_v4 }
 0x42d   : > { %v1488_v5 = vpop.xlane.xlu1 %1487 }
 0x42e   : > { %v1534_v6 = vadd.f32 %v1529_v60, %v1488_v5 }
 0x430   : > { %1551 = vst.msk [vmem:[%s2735_s15 + $0x18] sm:$0xff] %vm1547_vm3, %v1534_v6 }
 0x431   : > { %v1494_v33 = vpop.xlane.xlu1 %1493  ;;  %v1497_v42 = vpop.xlane.xlu0 %1496 }
 0x432   : > { %v1536_v8 = vadd.f32 %v1529_v60, %v1494_v33  ;;  %v1537_v9 = vadd.f32 %v1529_v60, %v1497_v42 }
 0x434   : > { %1553 = vst.msk [vmem:[%s2735_s15 + $0x28] sm:$0xff] %vm1547_vm3, %v1536_v8  ;;  %1554 = vst.msk [vmem:[%s2735_s15 + $0x30] sm:$0xff] %vm1547_vm3, %v1537_v9 }
 0x435   : > { %v1500_v57 = vpop.xlane.xlu1 %1499 }
 0x436   : > { %v1538_v10 = vadd.f32 %v1529_v60, %v1500_v57 }
 0x438   : > { %1555 = vst.msk [vmem:[%s2735_s15 + $0x38] sm:$0xff] %vm1547_vm3, %v1538_v10 }
 0x439   : > { %v1503_v11 = vpop.xlane.xlu0 %1502 }
 0x43a   : > { %v1539_v0 = vadd.f32 %v1529_v60, %v1503_v11 }
 0x43b   : > { %v1506_v2 = vpop.xlane.xlu1 %1505 }
 0x43c   : > { %1556 = vst.msk [vmem:[%s2735_s15 + $0x40] sm:$0xff] %vm1547_vm3, %v1539_v0  ;;  %v1540_v12 = vadd.f32 %v1529_v60, %v1506_v2 }
 0x43e   : > { %1557 = vst.msk [vmem:[%s2735_s15 + $0x48] sm:$0xff] %vm1547_vm3, %v1540_v12 }
 0x441   : > { %v1509_v13 = vpop.xlane.xlu0 %1508 }
 0x442   : > { %v1541_v15 = vadd.f32 %v1529_v60, %v1509_v13 }
 0x443   : > { %v1512_v7 = vpop.xlane.xlu1 %1511 }
 0x444   : > { %1558 = vst.msk [vmem:[%s2735_s15 + $0x50] sm:$0xff] %vm1547_vm3, %v1541_v15  ;;  %v1542_v16 = vadd.f32 %v1529_v60, %v1512_v7 }
 0x446   : > { %1559 = vst.msk [vmem:[%s2735_s15 + $0x58] sm:$0xff] %vm1547_vm3, %v1542_v16 }
 0x449   : > { %v1515_v17 = vpop.xlane.xlu0 %1514 }
 0x44a   : > { %v1543_v18 = vadd.f32 %v1529_v60, %v1515_v17 }
 0x44b   : > { %v1518_v19 = vpop.xlane.xlu1 %1517 }
 0x44c   : > { %1560 = vst.msk [vmem:[%s2735_s15 + $0x60] sm:$0xff] %vm1547_vm3, %v1543_v18  ;;  %v1544_v20 = vadd.f32 %v1529_v60, %v1518_v19 }
 0x44e   : > { %1561 = vst.msk [vmem:[%s2735_s15 + $0x68] sm:$0xff] %vm1547_vm3, %v1544_v20 }
 0x451   : > { %v1521_v21 = vpop.xlane.xlu0 %1520 }
 0x452   : > { %v1545_v25 = vadd.f32 %v1529_v60, %v1521_v21 }
 0x453   : > { %v1524_v27 = vpop.xlane.xlu1 %1523 }
 0x454   : > { %1562 = vst.msk [vmem:[%s2735_s15 + $0x70] sm:$0xff] %vm1547_vm3, %v1545_v25  ;;  %v1546_v28 = vadd.f32 %v1529_v60, %v1524_v27 }
 0x456   : > { %1563 = vst.msk [vmem:[%s2735_s15 + $0x78] sm:$0xff] %vm1547_vm3, %v1546_v28 }
 0x457 PF: > { %s21_s17 = sadd.s32 1, %s1987_s17  }
 0x458   : > { %p18_p4 = scmp.ge.s32.totalorder %s21_s17, 4  }
 0x45a   :  { %20 = sbr.rel (!%p18_p4) target bundleno = 1 (0x1), region = 114 }

</bundles_post_ra>
